<compile_context>
chip_gen: v6e
topology: v6e:2x2x1
jax: 0.10.0
libtpu: 0.0.40
codegen_flags: <defaults>
</compile_context>

<pallas_src>
import jax
import jax.numpy as jnp
from jax import lax
from jax.experimental import pallas as pl
from jax.experimental.pallas import tpu as pltpu  # noqa: F401  (imported per spec)

# ----------------------------- mini-CLIP config ------------------------------
IMG_SIZE = 16
PATCH = 8
N_PATCH = (IMG_SIZE // PATCH) ** 2          # 4 patches per image
PATCH_DIM = 3 * PATCH * PATCH               # 192
VIS_T = N_PATCH + 1                         # CLS + patches = 5
HIDDEN = 32
HEADS = 4
HEAD_DIM = HIDDEN // HEADS
MLP_DIM = 4 * HIDDEN
PROJ_DIM = 16
VOCAB = 64
SEQ = 8
LN_EPS = 1e-5
COS_EPS = 1e-8
NEG_INF = -1e9

LAYER_KEYS = ('wq', 'bq', 'wkT', 'bkT', 'wv', 'bv',
              'wo', 'bo', 'w1', 'b1', 'w2', 'b2')


# --------------------------- in-kernel math helpers ---------------------------
def _layernorm(x, g, b):
    """x: (M, D) f32, g/b: (1, D)."""
    mu = jnp.mean(x, axis=-1, keepdims=True)
    var = jnp.mean((x - mu) ** 2, axis=-1, keepdims=True)
    return (x - mu) * lax.rsqrt(var + LN_EPS) * g + b


def _iota2(shape, dim):
    return lax.broadcasted_iota(jnp.int32, shape, dim)


def _block_ids(shape, dim, t):
    """Integer-div-free group id floor(i / t), computed safely in f32."""
    return jnp.floor((_iota2(shape, dim).astype(jnp.float32) + 0.5) * (1.0 / t))


def _block_diag_bias(n, t):
    """Additive mask keeping attention within each example of the flat batch."""
    gi = _block_ids((n, n), 0, t)
    gj = _block_ids((n, n), 1, t)
    return jnp.where(gi == gj, 0.0, NEG_INF).astype(jnp.float32)


def _text_bias(maskf, n, s):
    """Block-diagonal + causal + key-padding additive mask built in-kernel."""
    gi = _block_ids((n, n), 0, s)
    gj = _block_ids((n, n), 1, s)
    ii = _iota2((n, n), 0)
    jj = _iota2((n, n), 1)
    # Within the same example, causality on flat indices equals causality on
    # per-example positions.  Fully padded query rows become uniform softmax
    # rows, which is harmless: pooling never selects them.
    keep = (gi == gj) & (ii >= jj) & (maskf > 0.5)
    return jnp.where(keep, 0.0, NEG_INF).astype(jnp.float32)


def _cls_sel(nb, n, t, offset):
    """(nb, n) one-hot rows selecting the CLS row of examples offset..offset+nb-1."""
    ri = _iota2((nb, n), 0).astype(jnp.float32)
    ci = _iota2((nb, n), 1).astype(jnp.float32)
    return (ci == (ri + float(offset)) * float(t)).astype(jnp.float32)


def _text_pool_sel(maskf, b, s, n):
    """(b, n) one-hot rows selecting the last non-padded token of each example."""
    ri = _iota2((b, n), 0).astype(jnp.float32)
    ci = _iota2((b, n), 1).astype(jnp.float32)
    in_blk = jnp.floor((ci + 0.5) * (1.0 / s)) == ri            # column j in example b
    counts = jnp.sum(jnp.where(in_blk, maskf, 0.0), axis=1, keepdims=True)   # (b, 1)
    idx = jnp.maximum(counts - 1.0, 0.0)                        # clamp all-pad rows
    return (ci == ri * float(s) + idx).astype(jnp.float32)


def _encoder_layer(x, bias, ln1g, ln1b, ln2g, ln2b,
                   wq, bq, wkT, bkT, wv, bv, wo, bo, w1, b1, w2, b2):
    """Pre-LN transformer encoder layer on flat (N, D) activations.

    Weight args are Refs; per-head q/v use static weight-column ref slices
    (narrow VMEM loads, no live-vreg lane shuffles).  Keys for all heads are
    produced by one fat matmul kT = Wk^T @ h^T (single operand transpose per
    layer) and sliced per head on 8-aligned sublanes.
    """
    d = HEAD_DIM
    scale = 1.0 / float(d) ** 0.5

    h = _layernorm(x, ln1g, ln1b)                                   # (N, D)
    # All-head transposed keys: (D, N).  contract-last-axis => one internal
    # transpose of h per layer (amortized over heads).
    kT = lax.dot_general(wkT[...], h, (((1,), (1,)), ((), ())),
                         preferred_element_type=jnp.float32) + bkT[...]

    acc = None
    for i in range(HEADS):                                          # static unroll
        lo, hi = i * d, (i + 1) * d
        q_i = jnp.dot(h, wq[:, lo:hi],
                      preferred_element_type=jnp.float32) + bq[:, lo:hi]   # (N, d)
        v_i = jnp.dot(h, wv[:, lo:hi],
                      preferred_element_type=jnp.float32) + bv[:, lo:hi]   # (N, d)
        s = jnp.dot(q_i, kT[lo:hi, :],
                    preferred_element_type=jnp.float32) * scale + bias     # (N, N)
        s = s - jnp.max(s, axis=-1, keepdims=True)
        p = jnp.exp(s)
        p = p / jnp.sum(p, axis=-1, keepdims=True)                   # exact division
        o = jnp.dot(p, v_i, preferred_element_type=jnp.float32)      # (N, d)
        # concat_h(o_h) @ Wo == sum_h o_h @ Wo[h*d:(h+1)*d, :]
        c = jnp.dot(o, wo[lo:hi, :], preferred_element_type=jnp.float32)   # (N, D)
        acc = c if acc is None else acc + c

    x = x + acc + bo[...]                                            # attn residual

    h2 = _layernorm(x, ln2g, ln2b)
    h2 = jnp.dot(h2, w1[...], preferred_element_type=jnp.float32) + b1[...]
    h2 = h2 * (1.0 / (1.0 + jnp.exp(-1.702 * h2)))                   # QuickGELU
    h2 = jnp.dot(h2, w2[...], preferred_element_type=jnp.float32) + b2[...]
    return x + h2                                                    # MLP residual


def _vision_tower(patches_ref, patch_w_ref, cls_pos_ref, ln_ref, layer):
    """Patch embed -> CLS/pos add -> pre-LN -> encoder layer.  Returns (N, D)."""
    n = patches_ref.shape[0]
    nb = n // VIS_T
    ln = ln_ref[...]
    # CLS rows of `patches` are zero, so their embedding arrives via cls_pos[0].
    x = jnp.dot(patches_ref[...], patch_w_ref[...],
                preferred_element_type=jnp.float32)                  # (N, D)
    pos = jnp.concatenate([cls_pos_ref[...]] * nb, axis=0)           # (N, D) in-kernel
    x = x + pos
    x = _layernorm(x, ln[0:1], ln[1:2])                              # pre-LN
    bias = _block_diag_bias(n, VIS_T)                                # in-kernel iota
    return _encoder_layer(x, bias, ln[2:3], ln[3:4], ln[4:5], ln[5:6], *layer)


def _text_tower(x_ref, maskf_ref, ln_ref, layer):
    """Embedded tokens -> encoder layer -> last-token pool -> LN.  Returns (B, D)."""
    n = x_ref.shape[0]                                               # B*S
    b = n // SEQ
    ln = ln_ref[...]
    maskf = maskf_ref[...]                                           # (1, B*S)
    x = x_ref[...].astype(jnp.float32)
    bias = _text_bias(maskf, n, SEQ)
    x = _encoder_layer(x, bias, ln[2:3], ln[3:4], ln[4:5], ln[5:6], *layer)
    # Pool at last non-padded token (stand-in for CLIP's EOS pooling); the final
    # per-row LayerNorm commutes with row selection.
    sel = _text_pool_sel(maskf, b, SEQ, n)                           # (B, B*S)
    pooled = jnp.dot(sel, x, preferred_element_type=jnp.float32)     # (B, D)
    return _layernorm(pooled, ln[6:7], ln[7:8])


def _cosine_loss(p1, p2):
    """1 - mean(cosine_similarity(p1, p2)) with per-norm clamping -> (1, 1)."""
    b = p1.shape[0]
    d = jnp.sum(p1 * p2, axis=-1, keepdims=True)
    n1 = jnp.sqrt(jnp.sum(p1 * p1, axis=-1, keepdims=True))
    n2 = jnp.sqrt(jnp.sum(p2 * p2, axis=-1, keepdims=True))
    sim = d / (jnp.maximum(n1, COS_EPS) * jnp.maximum(n2, COS_EPS))
    return 1.0 - jnp.sum(sim, axis=0, keepdims=True) / float(b)


# ------------------------------- fused kernels --------------------------------
def _img2img_kernel(patches_ref, patch_w_ref, cls_pos_ref, ln_ref,
                    wq, bq, wkT, bkT, wv, bv, wo, bo, w1, b1, w2, b2,
                    proj_ref, out_ref):
    """Whole img2img forward (shared vision tower on 2B images + loss)."""
    n = patches_ref.shape[0]
    b = (n // VIS_T) // 2
    layer = (wq, bq, wkT, bkT, wv, bv, wo, bo, w1, b1, w2, b2)
    x = _vision_tower(patches_ref, patch_w_ref, cls_pos_ref, ln_ref, layer)
    ln = ln_ref[...]
    sel1 = _cls_sel(b, n, VIS_T, 0)                                  # first B images
    sel2 = _cls_sel(b, n, VIS_T, b)                                  # second B images
    f1 = _layernorm(jnp.dot(sel1, x, preferred_element_type=jnp.float32),
                    ln[6:7], ln[7:8])
    f2 = _layernorm(jnp.dot(sel2, x, preferred_element_type=jnp.float32),
                    ln[6:7], ln[7:8])
    pw = proj_ref[...]
    p1 = jnp.dot(f1, pw, preferred_element_type=jnp.float32)
    p2 = jnp.dot(f2, pw, preferred_element_type=jnp.float32)
    out_ref[...] = _cosine_loss(p1, p2)


def _txt2img_kernel(x_txt_ref, maskf_ref, ln_t_ref,
                    twq, tbq, twkT, tbkT, twv, tbv, two, tbo, tw1, tb1, tw2, tb2,
                    proj_t_ref,
                    patches_ref, patch_w_ref, cls_pos_ref, ln_v_ref,
                    vwq, vbq, vwkT, vbkT, vwv, vbv, vwo, vbo, vw1, vb1, vw2, vb2,
                    proj_v_ref,
                    out_ref):
    """Whole txt2img forward (text tower + vision tower + loss) in one kernel."""
    t_layer = (twq, tbq, twkT, tbkT, twv, tbv, two, tbo, tw1, tb1, tw2, tb2)
    v_layer = (vwq, vbq, vwkT, vbkT, vwv, vbv, vwo, vbo, vw1, vb1, vw2, vb2)

    f_txt = _text_tower(x_txt_ref, maskf_ref, ln_t_ref, t_layer)     # (B, D)

    x_img = _vision_tower(patches_ref, patch_w_ref, cls_pos_ref, ln_v_ref, v_layer)
    n = patches_ref.shape[0]
    b = n // VIS_T
    ln_v = ln_v_ref[...]
    sel = _cls_sel(b, n, VIS_T, 0)
    f_img = _layernorm(jnp.dot(sel, x_img, preferred_element_type=jnp.float32),
                       ln_v[6:7], ln_v[7:8])

    p1 = jnp.dot(f_txt, proj_t_ref[...], preferred_element_type=jnp.float32)
    p2 = jnp.dot(f_img, proj_v_ref[...], preferred_element_type=jnp.float32)
    out_ref[...] = _cosine_loss(p1, p2)


# ------------------------------- XLA-side glue --------------------------------
def extract_patches(x):
    """x: (B, C, H, W) NCHW -> (B, N_PATCH, C*P*P) matching conv-weight layout."""
    B, C, H, W = x.shape
    x = x.reshape(B, C, H // PATCH, PATCH, W // PATCH, PATCH)
    x = x.transpose(0, 2, 4, 1, 3, 5)          # (B, nh, nw, C, P, P)
    return x.reshape(B, N_PATCH, C * PATCH * PATCH)


def _flat_patches(pixel_values):
    """(B, 3, H, W) -> (B*VIS_T, PATCH_DIM) with a zero CLS row per example."""
    b = pixel_values.shape[0]
    patches = extract_patches(pixel_values)                          # (B, N, 192)
    patches = jnp.pad(patches, ((0, 0), (1, 0), (0, 0)))             # zero CLS row
    return patches.reshape(b * VIS_T, PATCH_DIM)


def pallas_img2img_loss(vp, x1, x2):
    """loss = 1 - mean(cos_sim(vision(x1) @ P, vision(x2) @ P)); one fused kernel."""
    patches = _flat_patches(jnp.concatenate([x1, x2], axis=0))       # (2B*T, 192)
    lp = vp['layer']
    args = (patches, vp['patch_w'], vp['cls_pos'], vp['ln'],
            *(lp[k] for k in LAYER_KEYS), vp['proj_w'])
    return pl.pallas_call(
        _img2img_kernel,
        out_shape=jax.ShapeDtypeStruct((1, 1), jnp.float32),
    )(*args)


def pallas_txt2img_loss(tp, vp, input_ids, attention_mask, pixel_values):
    """loss = 1 - mean(cos_sim(text(ids) @ Pt, vision(img) @ Pv)); one fused kernel."""
    B, S = input_ids.shape
    # Embedding-table gather + position add stay in XLA (table gather has no
    # clean small-kernel equivalent); everything else is in the kernel.
    x_txt = (tp['tok_emb'][input_ids] + tp['pos_emb'][None, :S]).reshape(B * S, HIDDEN)
    maskf = attention_mask.astype(jnp.float32).reshape(1, B * S)
    patches = _flat_patches(pixel_values)                            # (B*T, 192)
    tl, vl = tp['layer'], vp['layer']
    args = (x_txt, maskf, tp['ln'],
            *(tl[k] for k in LAYER_KEYS), tp['proj_w'],
            patches, vp['patch_w'], vp['cls_pos'], vp['ln'],
            *(vl[k] for k in LAYER_KEYS), vp['proj_w'])
    return pl.pallas_call(
        _txt2img_kernel,
        out_shape=jax.ShapeDtypeStruct((1, 1), jnp.float32),
    )(*args)


# -------------------------------- param init ----------------------------------
def init_clip_params(key):
    keys = jax.random.split(key, 32)
    it = iter(keys)

    def nrm(shape, scale=0.02):
        return (scale * jax.random.normal(next(it), shape)).astype(jnp.float32)

    D, M = HIDDEN, MLP_DIM
    # Packed LayerNorm params: rows = [pre_g, pre_b, ln1_g, ln1_b, ln2_g, ln2_b,
    # out_g, out_b]  (rows 0/1 unused by the text tower).
    ln_pack = jnp.stack([jnp.ones((D,), jnp.float32),
                         jnp.zeros((D,), jnp.float32)] * 4)

    def init_layer():
        return dict(
            wq=nrm((D, D)),  bq=jnp.zeros((1, D), jnp.float32),
            # k weight stored pre-transposed (kernel computes kT = wkT @ h^T).
            wkT=nrm((D, D)), bkT=jnp.zeros((D, 1), jnp.float32),
            wv=nrm((D, D)),  bv=jnp.zeros((1, D), jnp.float32),
            wo=nrm((D, D)),  bo=jnp.zeros((1, D), jnp.float32),
            w1=nrm((D, M)),  b1=jnp.zeros((1, M), jnp.float32),
            w2=nrm((M, D)),  b2=jnp.zeros((1, D), jnp.float32),
        )

    cls = nrm((1, D))
    pos = nrm((VIS_T, D))
    vision = dict(
        patch_w=nrm((PATCH_DIM, D)),                 # CLIP patch conv has no bias
        cls_pos=jnp.concatenate([pos[0:1] + cls, pos[1:]], axis=0),   # (T, D)
        ln=ln_pack,
        layer=init_layer(),
        proj_w=nrm((D, PROJ_DIM)),
    )
    text = dict(
        tok_emb=nrm((VOCAB, D)),
        pos_emb=nrm((SEQ, D)),
        ln=ln_pack,
        layer=init_layer(),
        proj_w=nrm((D, PROJ_DIM)),
    )
    return dict(vision=vision, text=text)


# ------------------------------ module equivalent ------------------------------
class CLIPSimilarityLoss:
    """JAX/Pallas equivalent of the PyTorch CLIPSimilarityLoss module."""

    def __init__(self, sim_type, params):
        if sim_type not in ('img2img', 'txt2img'):
            raise ValueError(
                f"sim_type should be either 'img2img' or 'txt2img', but got {sim_type}")
        self.sim_type = sim_type
        self.params = params   # frozen synthetic mini-CLIP weights

    def __call__(self, x1, x2, attention_mask=None):
        vp, tp = self.params['vision'], self.params['text']
        if self.sim_type == 'img2img':
            loss = pallas_img2img_loss(vp, x1, x2)
        else:  # txt2img
            loss = pallas_txt2img_loss(tp, vp, x1, attention_mask, x2)
        return loss[0, 0]


# ------------------------------------ main -------------------------------------
if __name__ == "__main__":
    key = jax.random.PRNGKey(0)
    k1, k2, k3, k4, kp = jax.random.split(key, 5)
    params = init_clip_params(kp)

    # img2img: both inputs are NCHW images
    x1 = jax.random.normal(k1, (2, 3, IMG_SIZE, IMG_SIZE), jnp.float32)
    x2 = jax.random.normal(k2, (2, 3, IMG_SIZE, IMG_SIZE), jnp.float32)
    i2i = CLIPSimilarityLoss('img2img', params)
    loss_i2i = jax.block_until_ready(jax.jit(i2i.__call__)(x1, x2))

    # txt2img: token ids + attention mask vs. NCHW images
    ids = jax.random.randint(k3, (2, SEQ), 0, VOCAB)
    mask = jnp.array([[1, 1, 1, 1, 1, 0, 0, 0],
                      [1, 1, 1, 1, 1, 1, 1, 0]], dtype=jnp.int32)
    imgs = jax.random.normal(k4, (2, 3, IMG_SIZE, IMG_SIZE), jnp.float32)
    t2i = CLIPSimilarityLoss('txt2img', params)
    loss_t2i = jax.block_until_ready(jax.jit(t2i.__call__)(ids, imgs, mask))

    assert loss_i2i.shape == () and loss_t2i.shape == ()
    assert bool(jnp.isfinite(loss_i2i)) and bool(jnp.isfinite(loss_t2i))
    print("KERNEL_OK")
</pallas_src>

<mosaic_0001>
module attributes {stable_mosaic.version = 11 : i64} {
  func.func @_img2img_kernel(%arg0: memref<20x192xf32, #tpu.memory_space<vmem>>, %arg1: memref<192x32xf32, #tpu.memory_space<vmem>>, %arg2: memref<5x32xf32, #tpu.memory_space<vmem>>, %arg3: memref<8x32xf32, #tpu.memory_space<vmem>>, %arg4: memref<32x32xf32, #tpu.memory_space<vmem>>, %arg5: memref<1x32xf32, #tpu.memory_space<vmem>>, %arg6: memref<32x32xf32, #tpu.memory_space<vmem>>, %arg7: memref<32x1xf32, #tpu.memory_space<vmem>>, %arg8: memref<32x32xf32, #tpu.memory_space<vmem>>, %arg9: memref<1x32xf32, #tpu.memory_space<vmem>>, %arg10: memref<32x32xf32, #tpu.memory_space<vmem>>, %arg11: memref<1x32xf32, #tpu.memory_space<vmem>>, %arg12: memref<32x128xf32, #tpu.memory_space<vmem>>, %arg13: memref<1x128xf32, #tpu.memory_space<vmem>>, %arg14: memref<128x32xf32, #tpu.memory_space<vmem>>, %arg15: memref<1x32xf32, #tpu.memory_space<vmem>>, %arg16: memref<32x16xf32, #tpu.memory_space<vmem>>, %arg17: memref<1x1xf32, #tpu.memory_space<vmem>>) attributes {dimension_semantics = [], scalar_prefetch = 0 : i64, scratch_operands = 0 : i64, tpu.core_type = #tpu.core_type<tc>} {
    %c0 = arith.constant 0 : index
    %c0_0 = arith.constant 0 : index
    %0 = vector.load %arg3[%c0, %c0_0] : memref<8x32xf32, #tpu.memory_space<vmem>>, vector<8x32xf32>
    %c0_1 = arith.constant 0 : index
    %c0_2 = arith.constant 0 : index
    %1 = vector.load %arg0[%c0_1, %c0_2] : memref<20x192xf32, #tpu.memory_space<vmem>>, vector<20x192xf32>
    %c0_3 = arith.constant 0 : index
    %c0_4 = arith.constant 0 : index
    %2 = vector.load %arg1[%c0_3, %c0_4] : memref<192x32xf32, #tpu.memory_space<vmem>>, vector<192x32xf32>
    %cst = arith.constant dense<0.000000e+00> : vector<20x32xf32>
    %3 = tpu.matmul %1, %2, %cst {dimension_numbers = #tpu.dot_dimension_numbers<[1], [0], [0], [1], [0, 0, 1, 1], [], []>} : vector<20x192xf32>, vector<192x32xf32>, vector<20x32xf32> -> vector<20x32xf32>
    %c0_5 = arith.constant 0 : index
    %c0_6 = arith.constant 0 : index
    %4 = vector.load %arg2[%c0_5, %c0_6] : memref<5x32xf32, #tpu.memory_space<vmem>>, vector<5x32xf32>
    %5 = tpu.concatenate %4, %4, %4, %4 in 0 : vector<5x32xf32>, vector<5x32xf32>, vector<5x32xf32>, vector<5x32xf32> -> vector<20x32xf32>
    %6 = arith.addf %3, %5 : vector<20x32xf32>
    %7 = vector.extract_strided_slice %0 {offsets = [0, 0], sizes = [1, 32], strides = [1, 1]} : vector<8x32xf32> to vector<1x32xf32>
    %8 = vector.extract_strided_slice %0 {offsets = [1, 0], sizes = [1, 32], strides = [1, 1]} : vector<8x32xf32> to vector<1x32xf32>
    %cst_7 = arith.constant dense<0.000000e+00> : vector<20xf32>
    %9 = vector.multi_reduction <add>, %6, %cst_7 [1] : vector<20x32xf32> to vector<20xf32>
    %10 = vector.shape_cast %9 : vector<20xf32> to vector<20x1xf32>
    %cst_8 = arith.constant 3.200000e+01 : f32
    %11 = vector.broadcast %cst_8 : f32 to vector<20x1xf32>
    %12 = arith.divf %10, %11 : vector<20x1xf32>
    %13 = vector.broadcast %12 : vector<20x1xf32> to vector<20x32xf32>
    %14 = arith.subf %6, %13 : vector<20x32xf32>
    %15 = arith.mulf %14, %14 : vector<20x32xf32>
    %cst_9 = arith.constant dense<0.000000e+00> : vector<20xf32>
    %16 = vector.multi_reduction <add>, %15, %cst_9 [1] : vector<20x32xf32> to vector<20xf32>
    %17 = vector.shape_cast %16 : vector<20xf32> to vector<20x1xf32>
    %cst_10 = arith.constant 3.200000e+01 : f32
    %18 = vector.broadcast %cst_10 : f32 to vector<20x1xf32>
    %19 = arith.divf %17, %18 : vector<20x1xf32>
    %20 = vector.broadcast %12 : vector<20x1xf32> to vector<20x32xf32>
    %21 = arith.subf %6, %20 : vector<20x32xf32>
    %cst_11 = arith.constant 9.99999974E-6 : f32
    %22 = vector.broadcast %cst_11 : f32 to vector<20x1xf32>
    %23 = arith.addf %19, %22 : vector<20x1xf32>
    %24 = math.rsqrt %23 : vector<20x1xf32>
    %25 = vector.broadcast %24 : vector<20x1xf32> to vector<20x32xf32>
    %26 = arith.mulf %21, %25 : vector<20x32xf32>
    %27 = vector.broadcast %7 : vector<1x32xf32> to vector<20x32xf32>
    %28 = arith.mulf %26, %27 : vector<20x32xf32>
    %29 = vector.broadcast %8 : vector<1x32xf32> to vector<20x32xf32>
    %30 = arith.addf %28, %29 : vector<20x32xf32>
    %31 = tpu.iota {dimensions = array<i32: 0>} : vector<20x20xi32>
    %32 = arith.sitofp %31 : vector<20x20xi32> to vector<20x20xf32>
    %cst_12 = arith.constant 5.000000e-01 : f32
    %33 = vector.broadcast %cst_12 : f32 to vector<20x20xf32>
    %34 = arith.addf %32, %33 : vector<20x20xf32>
    %cst_13 = arith.constant 2.000000e-01 : f32
    %35 = vector.broadcast %cst_13 : f32 to vector<20x20xf32>
    %36 = arith.mulf %34, %35 : vector<20x20xf32>
    %37 = math.floor %36 : vector<20x20xf32>
    %38 = tpu.iota {dimensions = array<i32: 1>} : vector<20x20xi32>
    %39 = arith.sitofp %38 : vector<20x20xi32> to vector<20x20xf32>
    %cst_14 = arith.constant 5.000000e-01 : f32
    %40 = vector.broadcast %cst_14 : f32 to vector<20x20xf32>
    %41 = arith.addf %39, %40 : vector<20x20xf32>
    %cst_15 = arith.constant 2.000000e-01 : f32
    %42 = vector.broadcast %cst_15 : f32 to vector<20x20xf32>
    %43 = arith.mulf %41, %42 : vector<20x20xf32>
    %44 = math.floor %43 : vector<20x20xf32>
    %45 = arith.cmpf oeq, %37, %44 : vector<20x20xf32>
    %cst_16 = arith.constant 0.000000e+00 : f32
    %cst_17 = arith.constant -1.000000e+09 : f32
    %46 = vector.broadcast %cst_16 : f32 to vector<20x20xf32>
    %47 = vector.broadcast %cst_17 : f32 to vector<20x20xf32>
    %48 = arith.select %45, %46, %47 : vector<20x20xi1>, vector<20x20xf32>
    %49 = vector.extract_strided_slice %0 {offsets = [2, 0], sizes = [1, 32], strides = [1, 1]} : vector<8x32xf32> to vector<1x32xf32>
    %50 = vector.extract_strided_slice %0 {offsets = [3, 0], sizes = [1, 32], strides = [1, 1]} : vector<8x32xf32> to vector<1x32xf32>
    %51 = vector.extract_strided_slice %0 {offsets = [4, 0], sizes = [1, 32], strides = [1, 1]} : vector<8x32xf32> to vector<1x32xf32>
    %52 = vector.extract_strided_slice %0 {offsets = [5, 0], sizes = [1, 32], strides = [1, 1]} : vector<8x32xf32> to vector<1x32xf32>
    %cst_18 = arith.constant dense<0.000000e+00> : vector<20xf32>
    %53 = vector.multi_reduction <add>, %30, %cst_18 [1] : vector<20x32xf32> to vector<20xf32>
    %54 = vector.shape_cast %53 : vector<20xf32> to vector<20x1xf32>
    %cst_19 = arith.constant 3.200000e+01 : f32
    %55 = vector.broadcast %cst_19 : f32 to vector<20x1xf32>
    %56 = arith.divf %54, %55 : vector<20x1xf32>
    %57 = vector.broadcast %56 : vector<20x1xf32> to vector<20x32xf32>
    %58 = arith.subf %30, %57 : vector<20x32xf32>
    %59 = arith.mulf %58, %58 : vector<20x32xf32>
    %cst_20 = arith.constant dense<0.000000e+00> : vector<20xf32>
    %60 = vector.multi_reduction <add>, %59, %cst_20 [1] : vector<20x32xf32> to vector<20xf32>
    %61 = vector.shape_cast %60 : vector<20xf32> to vector<20x1xf32>
    %cst_21 = arith.constant 3.200000e+01 : f32
    %62 = vector.broadcast %cst_21 : f32 to vector<20x1xf32>
    %63 = arith.divf %61, %62 : vector<20x1xf32>
    %64 = vector.broadcast %56 : vector<20x1xf32> to vector<20x32xf32>
    %65 = arith.subf %30, %64 : vector<20x32xf32>
    %cst_22 = arith.constant 9.99999974E-6 : f32
    %66 = vector.broadcast %cst_22 : f32 to vector<20x1xf32>
    %67 = arith.addf %63, %66 : vector<20x1xf32>
    %68 = math.rsqrt %67 : vector<20x1xf32>
    %69 = vector.broadcast %68 : vector<20x1xf32> to vector<20x32xf32>
    %70 = arith.mulf %65, %69 : vector<20x32xf32>
    %71 = vector.broadcast %49 : vector<1x32xf32> to vector<20x32xf32>
    %72 = arith.mulf %70, %71 : vector<20x32xf32>
    %73 = vector.broadcast %50 : vector<1x32xf32> to vector<20x32xf32>
    %74 = arith.addf %72, %73 : vector<20x32xf32>
    %c0_23 = arith.constant 0 : index
    %c0_24 = arith.constant 0 : index
    %75 = vector.load %arg6[%c0_23, %c0_24] : memref<32x32xf32, #tpu.memory_space<vmem>>, vector<32x32xf32>
    %cst_25 = arith.constant dense<0.000000e+00> : vector<32x20xf32>
    %76 = tpu.matmul %75, %74, %cst_25 {dimension_numbers = #tpu.dot_dimension_numbers<[1], [1], [0], [0], [0, 0, 1, 0], [], []>} : vector<32x32xf32>, vector<20x32xf32>, vector<32x20xf32> -> vector<32x20xf32>
    %c0_26 = arith.constant 0 : index
    %c0_27 = arith.constant 0 : index
    %77 = vector.load %arg7[%c0_26, %c0_27] : memref<32x1xf32, #tpu.memory_space<vmem>>, vector<32x1xf32>
    %78 = vector.broadcast %77 : vector<32x1xf32> to vector<32x20xf32>
    %79 = arith.addf %76, %78 : vector<32x20xf32>
    %c0_28 = arith.constant 0 : index
    %c0_29 = arith.constant 0 : index
    %80 = vector.load %arg4[%c0_28, %c0_29] : memref<32x32xf32, #tpu.memory_space<vmem>>, vector<32x8xf32>
    %cst_30 = arith.constant dense<0.000000e+00> : vector<20x8xf32>
    %81 = tpu.matmul %74, %80, %cst_30 {dimension_numbers = #tpu.dot_dimension_numbers<[1], [0], [0], [1], [0, 0, 1, 1], [], []>} : vector<20x32xf32>, vector<32x8xf32>, vector<20x8xf32> -> vector<20x8xf32>
    %c0_31 = arith.constant 0 : index
    %c0_32 = arith.constant 0 : index
    %82 = vector.load %arg5[%c0_31, %c0_32] : memref<1x32xf32, #tpu.memory_space<vmem>>, vector<1x8xf32>
    %83 = vector.broadcast %82 : vector<1x8xf32> to vector<20x8xf32>
    %84 = arith.addf %81, %83 : vector<20x8xf32>
    %c0_33 = arith.constant 0 : index
    %c0_34 = arith.constant 0 : index
    %85 = vector.load %arg8[%c0_33, %c0_34] : memref<32x32xf32, #tpu.memory_space<vmem>>, vector<32x8xf32>
    %cst_35 = arith.constant dense<0.000000e+00> : vector<20x8xf32>
    %86 = tpu.matmul %74, %85, %cst_35 {dimension_numbers = #tpu.dot_dimension_numbers<[1], [0], [0], [1], [0, 0, 1, 1], [], []>} : vector<20x32xf32>, vector<32x8xf32>, vector<20x8xf32> -> vector<20x8xf32>
    %c0_36 = arith.constant 0 : index
    %c0_37 = arith.constant 0 : index
    %87 = vector.load %arg9[%c0_36, %c0_37] : memref<1x32xf32, #tpu.memory_space<vmem>>, vector<1x8xf32>
    %88 = vector.broadcast %87 : vector<1x8xf32> to vector<20x8xf32>
    %89 = arith.addf %86, %88 : vector<20x8xf32>
    %90 = vector.extract_strided_slice %79 {offsets = [0, 0], sizes = [8, 20], strides = [1, 1]} : vector<32x20xf32> to vector<8x20xf32>
    %cst_38 = arith.constant dense<0.000000e+00> : vector<20x20xf32>
    %91 = tpu.matmul %84, %90, %cst_38 {dimension_numbers = #tpu.dot_dimension_numbers<[1], [0], [0], [1], [0, 0, 1, 1], [], []>} : vector<20x8xf32>, vector<8x20xf32>, vector<20x20xf32> -> vector<20x20xf32>
    %cst_39 = arith.constant 0.353553385 : f32
    %92 = vector.broadcast %cst_39 : f32 to vector<20x20xf32>
    %93 = arith.mulf %91, %92 : vector<20x20xf32>
    %94 = arith.addf %93, %48 : vector<20x20xf32>
    %cst_40 = arith.constant dense<0xFF800000> : vector<20xf32>
    %95 = vector.multi_reduction <maximumf>, %94, %cst_40 [1] : vector<20x20xf32> to vector<20xf32>
    %96 = vector.shape_cast %95 : vector<20xf32> to vector<20x1xf32>
    %97 = vector.broadcast %96 : vector<20x1xf32> to vector<20x20xf32>
    %98 = arith.subf %94, %97 : vector<20x20xf32>
    %99 = math.exp %98 : vector<20x20xf32>
    %cst_41 = arith.constant dense<0.000000e+00> : vector<20xf32>
    %100 = vector.multi_reduction <add>, %99, %cst_41 [1] : vector<20x20xf32> to vector<20xf32>
    %101 = vector.shape_cast %100 : vector<20xf32> to vector<20x1xf32>
    %102 = vector.broadcast %101 : vector<20x1xf32> to vector<20x20xf32>
    %103 = arith.divf %99, %102 : vector<20x20xf32>
    %cst_42 = arith.constant dense<0.000000e+00> : vector<20x8xf32>
    %104 = tpu.matmul %103, %89, %cst_42 {dimension_numbers = #tpu.dot_dimension_numbers<[1], [0], [0], [1], [0, 0, 1, 1], [], []>} : vector<20x20xf32>, vector<20x8xf32>, vector<20x8xf32> -> vector<20x8xf32>
    %c0_43 = arith.constant 0 : index
    %c0_44 = arith.constant 0 : index
    %105 = vector.load %arg10[%c0_43, %c0_44] : memref<32x32xf32, #tpu.memory_space<vmem>>, vector<8x32xf32>
    %cst_45 = arith.constant dense<0.000000e+00> : vector<20x32xf32>
    %106 = tpu.matmul %104, %105, %cst_45 {dimension_numbers = #tpu.dot_dimension_numbers<[1], [0], [0], [1], [0, 0, 1, 1], [], []>} : vector<20x8xf32>, vector<8x32xf32>, vector<20x32xf32> -> vector<20x32xf32>
    %c0_46 = arith.constant 0 : index
    %c8 = arith.constant 8 : index
    %107 = vector.load %arg4[%c0_46, %c8] : memref<32x32xf32, #tpu.memory_space<vmem>>, vector<32x8xf32>
    %cst_47 = arith.constant dense<0.000000e+00> : vector<20x8xf32>
    %108 = tpu.matmul %74, %107, %cst_47 {dimension_numbers = #tpu.dot_dimension_numbers<[1], [0], [0], [1], [0, 0, 1, 1], [], []>} : vector<20x32xf32>, vector<32x8xf32>, vector<20x8xf32> -> vector<20x8xf32>
    %c0_48 = arith.constant 0 : index
    %c8_49 = arith.constant 8 : index
    %109 = vector.load %arg5[%c0_48, %c8_49] : memref<1x32xf32, #tpu.memory_space<vmem>>, vector<1x8xf32>
    %110 = vector.broadcast %109 : vector<1x8xf32> to vector<20x8xf32>
    %111 = arith.addf %108, %110 : vector<20x8xf32>
    %c0_50 = arith.constant 0 : index
    %c8_51 = arith.constant 8 : index
    %112 = vector.load %arg8[%c0_50, %c8_51] : memref<32x32xf32, #tpu.memory_space<vmem>>, vector<32x8xf32>
    %cst_52 = arith.constant dense<0.000000e+00> : vector<20x8xf32>
    %113 = tpu.matmul %74, %112, %cst_52 {dimension_numbers = #tpu.dot_dimension_numbers<[1], [0], [0], [1], [0, 0, 1, 1], [], []>} : vector<20x32xf32>, vector<32x8xf32>, vector<20x8xf32> -> vector<20x8xf32>
    %c0_53 = arith.constant 0 : index
    %c8_54 = arith.constant 8 : index
    %114 = vector.load %arg9[%c0_53, %c8_54] : memref<1x32xf32, #tpu.memory_space<vmem>>, vector<1x8xf32>
    %115 = vector.broadcast %114 : vector<1x8xf32> to vector<20x8xf32>
    %116 = arith.addf %113, %115 : vector<20x8xf32>
    %117 = vector.extract_strided_slice %79 {offsets = [8, 0], sizes = [8, 20], strides = [1, 1]} : vector<32x20xf32> to vector<8x20xf32>
    %cst_55 = arith.constant dense<0.000000e+00> : vector<20x20xf32>
    %118 = tpu.matmul %111, %117, %cst_55 {dimension_numbers = #tpu.dot_dimension_numbers<[1], [0], [0], [1], [0, 0, 1, 1], [], []>} : vector<20x8xf32>, vector<8x20xf32>, vector<20x20xf32> -> vector<20x20xf32>
    %cst_56 = arith.constant 0.353553385 : f32
    %119 = vector.broadcast %cst_56 : f32 to vector<20x20xf32>
    %120 = arith.mulf %118, %119 : vector<20x20xf32>
    %121 = arith.addf %120, %48 : vector<20x20xf32>
    %cst_57 = arith.constant dense<0xFF800000> : vector<20xf32>
    %122 = vector.multi_reduction <maximumf>, %121, %cst_57 [1] : vector<20x20xf32> to vector<20xf32>
    %123 = vector.shape_cast %122 : vector<20xf32> to vector<20x1xf32>
    %124 = vector.broadcast %123 : vector<20x1xf32> to vector<20x20xf32>
    %125 = arith.subf %121, %124 : vector<20x20xf32>
    %126 = math.exp %125 : vector<20x20xf32>
    %cst_58 = arith.constant dense<0.000000e+00> : vector<20xf32>
    %127 = vector.multi_reduction <add>, %126, %cst_58 [1] : vector<20x20xf32> to vector<20xf32>
    %128 = vector.shape_cast %127 : vector<20xf32> to vector<20x1xf32>
    %129 = vector.broadcast %128 : vector<20x1xf32> to vector<20x20xf32>
    %130 = arith.divf %126, %129 : vector<20x20xf32>
    %cst_59 = arith.constant dense<0.000000e+00> : vector<20x8xf32>
    %131 = tpu.matmul %130, %116, %cst_59 {dimension_numbers = #tpu.dot_dimension_numbers<[1], [0], [0], [1], [0, 0, 1, 1], [], []>} : vector<20x20xf32>, vector<20x8xf32>, vector<20x8xf32> -> vector<20x8xf32>
    %c8_60 = arith.constant 8 : index
    %c0_61 = arith.constant 0 : index
    %132 = vector.load %arg10[%c8_60, %c0_61] : memref<32x32xf32, #tpu.memory_space<vmem>>, vector<8x32xf32>
    %cst_62 = arith.constant dense<0.000000e+00> : vector<20x32xf32>
    %133 = tpu.matmul %131, %132, %cst_62 {dimension_numbers = #tpu.dot_dimension_numbers<[1], [0], [0], [1], [0, 0, 1, 1], [], []>} : vector<20x8xf32>, vector<8x32xf32>, vector<20x32xf32> -> vector<20x32xf32>
    %134 = arith.addf %106, %133 : vector<20x32xf32>
    %c0_63 = arith.constant 0 : index
    %c16 = arith.constant 16 : index
    %135 = vector.load %arg4[%c0_63, %c16] : memref<32x32xf32, #tpu.memory_space<vmem>>, vector<32x8xf32>
    %cst_64 = arith.constant dense<0.000000e+00> : vector<20x8xf32>
    %136 = tpu.matmul %74, %135, %cst_64 {dimension_numbers = #tpu.dot_dimension_numbers<[1], [0], [0], [1], [0, 0, 1, 1], [], []>} : vector<20x32xf32>, vector<32x8xf32>, vector<20x8xf32> -> vector<20x8xf32>
    %c0_65 = arith.constant 0 : index
    %c16_66 = arith.constant 16 : index
    %137 = vector.load %arg5[%c0_65, %c16_66] : memref<1x32xf32, #tpu.memory_space<vmem>>, vector<1x8xf32>
    %138 = vector.broadcast %137 : vector<1x8xf32> to vector<20x8xf32>
    %139 = arith.addf %136, %138 : vector<20x8xf32>
    %c0_67 = arith.constant 0 : index
    %c16_68 = arith.constant 16 : index
    %140 = vector.load %arg8[%c0_67, %c16_68] : memref<32x32xf32, #tpu.memory_space<vmem>>, vector<32x8xf32>
    %cst_69 = arith.constant dense<0.000000e+00> : vector<20x8xf32>
    %141 = tpu.matmul %74, %140, %cst_69 {dimension_numbers = #tpu.dot_dimension_numbers<[1], [0], [0], [1], [0, 0, 1, 1], [], []>} : vector<20x32xf32>, vector<32x8xf32>, vector<20x8xf32> -> vector<20x8xf32>
    %c0_70 = arith.constant 0 : index
    %c16_71 = arith.constant 16 : index
    %142 = vector.load %arg9[%c0_70, %c16_71] : memref<1x32xf32, #tpu.memory_space<vmem>>, vector<1x8xf32>
    %143 = vector.broadcast %142 : vector<1x8xf32> to vector<20x8xf32>
    %144 = arith.addf %141, %143 : vector<20x8xf32>
    %145 = vector.extract_strided_slice %79 {offsets = [16, 0], sizes = [8, 20], strides = [1, 1]} : vector<32x20xf32> to vector<8x20xf32>
    %cst_72 = arith.constant dense<0.000000e+00> : vector<20x20xf32>
    %146 = tpu.matmul %139, %145, %cst_72 {dimension_numbers = #tpu.dot_dimension_numbers<[1], [0], [0], [1], [0, 0, 1, 1], [], []>} : vector<20x8xf32>, vector<8x20xf32>, vector<20x20xf32> -> vector<20x20xf32>
    %cst_73 = arith.constant 0.353553385 : f32
    %147 = vector.broadcast %cst_73 : f32 to vector<20x20xf32>
    %148 = arith.mulf %146, %147 : vector<20x20xf32>
    %149 = arith.addf %148, %48 : vector<20x20xf32>
    %cst_74 = arith.constant dense<0xFF800000> : vector<20xf32>
    %150 = vector.multi_reduction <maximumf>, %149, %cst_74 [1] : vector<20x20xf32> to vector<20xf32>
    %151 = vector.shape_cast %150 : vector<20xf32> to vector<20x1xf32>
    %152 = vector.broadcast %151 : vector<20x1xf32> to vector<20x20xf32>
    %153 = arith.subf %149, %152 : vector<20x20xf32>
    %154 = math.exp %153 : vector<20x20xf32>
    %cst_75 = arith.constant dense<0.000000e+00> : vector<20xf32>
    %155 = vector.multi_reduction <add>, %154, %cst_75 [1] : vector<20x20xf32> to vector<20xf32>
    %156 = vector.shape_cast %155 : vector<20xf32> to vector<20x1xf32>
    %157 = vector.broadcast %156 : vector<20x1xf32> to vector<20x20xf32>
    %158 = arith.divf %154, %157 : vector<20x20xf32>
    %cst_76 = arith.constant dense<0.000000e+00> : vector<20x8xf32>
    %159 = tpu.matmul %158, %144, %cst_76 {dimension_numbers = #tpu.dot_dimension_numbers<[1], [0], [0], [1], [0, 0, 1, 1], [], []>} : vector<20x20xf32>, vector<20x8xf32>, vector<20x8xf32> -> vector<20x8xf32>
    %c16_77 = arith.constant 16 : index
    %c0_78 = arith.constant 0 : index
    %160 = vector.load %arg10[%c16_77, %c0_78] : memref<32x32xf32, #tpu.memory_space<vmem>>, vector<8x32xf32>
    %cst_79 = arith.constant dense<0.000000e+00> : vector<20x32xf32>
    %161 = tpu.matmul %159, %160, %cst_79 {dimension_numbers = #tpu.dot_dimension_numbers<[1], [0], [0], [1], [0, 0, 1, 1], [], []>} : vector<20x8xf32>, vector<8x32xf32>, vector<20x32xf32> -> vector<20x32xf32>
    %162 = arith.addf %134, %161 : vector<20x32xf32>
    %c0_80 = arith.constant 0 : index
    %c24 = arith.constant 24 : index
    %163 = vector.load %arg4[%c0_80, %c24] : memref<32x32xf32, #tpu.memory_space<vmem>>, vector<32x8xf32>
    %cst_81 = arith.constant dense<0.000000e+00> : vector<20x8xf32>
    %164 = tpu.matmul %74, %163, %cst_81 {dimension_numbers = #tpu.dot_dimension_numbers<[1], [0], [0], [1], [0, 0, 1, 1], [], []>} : vector<20x32xf32>, vector<32x8xf32>, vector<20x8xf32> -> vector<20x8xf32>
    %c0_82 = arith.constant 0 : index
    %c24_83 = arith.constant 24 : index
    %165 = vector.load %arg5[%c0_82, %c24_83] : memref<1x32xf32, #tpu.memory_space<vmem>>, vector<1x8xf32>
    %166 = vector.broadcast %165 : vector<1x8xf32> to vector<20x8xf32>
    %167 = arith.addf %164, %166 : vector<20x8xf32>
    %c0_84 = arith.constant 0 : index
    %c24_85 = arith.constant 24 : index
    %168 = vector.load %arg8[%c0_84, %c24_85] : memref<32x32xf32, #tpu.memory_space<vmem>>, vector<32x8xf32>
    %cst_86 = arith.constant dense<0.000000e+00> : vector<20x8xf32>
    %169 = tpu.matmul %74, %168, %cst_86 {dimension_numbers = #tpu.dot_dimension_numbers<[1], [0], [0], [1], [0, 0, 1, 1], [], []>} : vector<20x32xf32>, vector<32x8xf32>, vector<20x8xf32> -> vector<20x8xf32>
    %c0_87 = arith.constant 0 : index
    %c24_88 = arith.constant 24 : index
    %170 = vector.load %arg9[%c0_87, %c24_88] : memref<1x32xf32, #tpu.memory_space<vmem>>, vector<1x8xf32>
    %171 = vector.broadcast %170 : vector<1x8xf32> to vector<20x8xf32>
    %172 = arith.addf %169, %171 : vector<20x8xf32>
    %173 = vector.extract_strided_slice %79 {offsets = [24, 0], sizes = [8, 20], strides = [1, 1]} : vector<32x20xf32> to vector<8x20xf32>
    %cst_89 = arith.constant dense<0.000000e+00> : vector<20x20xf32>
    %174 = tpu.matmul %167, %173, %cst_89 {dimension_numbers = #tpu.dot_dimension_numbers<[1], [0], [0], [1], [0, 0, 1, 1], [], []>} : vector<20x8xf32>, vector<8x20xf32>, vector<20x20xf32> -> vector<20x20xf32>
    %cst_90 = arith.constant 0.353553385 : f32
    %175 = vector.broadcast %cst_90 : f32 to vector<20x20xf32>
    %176 = arith.mulf %174, %175 : vector<20x20xf32>
    %177 = arith.addf %176, %48 : vector<20x20xf32>
    %cst_91 = arith.constant dense<0xFF800000> : vector<20xf32>
    %178 = vector.multi_reduction <maximumf>, %177, %cst_91 [1] : vector<20x20xf32> to vector<20xf32>
    %179 = vector.shape_cast %178 : vector<20xf32> to vector<20x1xf32>
    %180 = vector.broadcast %179 : vector<20x1xf32> to vector<20x20xf32>
    %181 = arith.subf %177, %180 : vector<20x20xf32>
    %182 = math.exp %181 : vector<20x20xf32>
    %cst_92 = arith.constant dense<0.000000e+00> : vector<20xf32>
    %183 = vector.multi_reduction <add>, %182, %cst_92 [1] : vector<20x20xf32> to vector<20xf32>
    %184 = vector.shape_cast %183 : vector<20xf32> to vector<20x1xf32>
    %185 = vector.broadcast %184 : vector<20x1xf32> to vector<20x20xf32>
    %186 = arith.divf %182, %185 : vector<20x20xf32>
    %cst_93 = arith.constant dense<0.000000e+00> : vector<20x8xf32>
    %187 = tpu.matmul %186, %172, %cst_93 {dimension_numbers = #tpu.dot_dimension_numbers<[1], [0], [0], [1], [0, 0, 1, 1], [], []>} : vector<20x20xf32>, vector<20x8xf32>, vector<20x8xf32> -> vector<20x8xf32>
    %c24_94 = arith.constant 24 : index
    %c0_95 = arith.constant 0 : index
    %188 = vector.load %arg10[%c24_94, %c0_95] : memref<32x32xf32, #tpu.memory_space<vmem>>, vector<8x32xf32>
    %cst_96 = arith.constant dense<0.000000e+00> : vector<20x32xf32>
    %189 = tpu.matmul %187, %188, %cst_96 {dimension_numbers = #tpu.dot_dimension_numbers<[1], [0], [0], [1], [0, 0, 1, 1], [], []>} : vector<20x8xf32>, vector<8x32xf32>, vector<20x32xf32> -> vector<20x32xf32>
    %190 = arith.addf %162, %189 : vector<20x32xf32>
    %191 = arith.addf %30, %190 : vector<20x32xf32>
    %c0_97 = arith.constant 0 : index
    %c0_98 = arith.constant 0 : index
    %192 = vector.load %arg11[%c0_97, %c0_98] : memref<1x32xf32, #tpu.memory_space<vmem>>, vector<1x32xf32>
    %193 = vector.broadcast %192 : vector<1x32xf32> to vector<20x32xf32>
    %194 = arith.addf %191, %193 : vector<20x32xf32>
    %cst_99 = arith.constant dense<0.000000e+00> : vector<20xf32>
    %195 = vector.multi_reduction <add>, %194, %cst_99 [1] : vector<20x32xf32> to vector<20xf32>
    %196 = vector.shape_cast %195 : vector<20xf32> to vector<20x1xf32>
    %cst_100 = arith.constant 3.200000e+01 : f32
    %197 = vector.broadcast %cst_100 : f32 to vector<20x1xf32>
    %198 = arith.divf %196, %197 : vector<20x1xf32>
    %199 = vector.broadcast %198 : vector<20x1xf32> to vector<20x32xf32>
    %200 = arith.subf %194, %199 : vector<20x32xf32>
    %201 = arith.mulf %200, %200 : vector<20x32xf32>
    %cst_101 = arith.constant dense<0.000000e+00> : vector<20xf32>
    %202 = vector.multi_reduction <add>, %201, %cst_101 [1] : vector<20x32xf32> to vector<20xf32>
    %203 = vector.shape_cast %202 : vector<20xf32> to vector<20x1xf32>
    %cst_102 = arith.constant 3.200000e+01 : f32
    %204 = vector.broadcast %cst_102 : f32 to vector<20x1xf32>
    %205 = arith.divf %203, %204 : vector<20x1xf32>
    %206 = vector.broadcast %198 : vector<20x1xf32> to vector<20x32xf32>
    %207 = arith.subf %194, %206 : vector<20x32xf32>
    %cst_103 = arith.constant 9.99999974E-6 : f32
    %208 = vector.broadcast %cst_103 : f32 to vector<20x1xf32>
    %209 = arith.addf %205, %208 : vector<20x1xf32>
    %210 = math.rsqrt %209 : vector<20x1xf32>
    %211 = vector.broadcast %210 : vector<20x1xf32> to vector<20x32xf32>
    %212 = arith.mulf %207, %211 : vector<20x32xf32>
    %213 = vector.broadcast %51 : vector<1x32xf32> to vector<20x32xf32>
    %214 = arith.mulf %212, %213 : vector<20x32xf32>
    %215 = vector.broadcast %52 : vector<1x32xf32> to vector<20x32xf32>
    %216 = arith.addf %214, %215 : vector<20x32xf32>
    %c0_104 = arith.constant 0 : index
    %c0_105 = arith.constant 0 : index
    %217 = vector.load %arg12[%c0_104, %c0_105] : memref<32x128xf32, #tpu.memory_space<vmem>>, vector<32x128xf32>
    %cst_106 = arith.constant dense<0.000000e+00> : vector<20x128xf32>
    %218 = tpu.matmul %216, %217, %cst_106 {dimension_numbers = #tpu.dot_dimension_numbers<[1], [0], [0], [1], [0, 0, 1, 1], [], []>} : vector<20x32xf32>, vector<32x128xf32>, vector<20x128xf32> -> vector<20x128xf32>
    %c0_107 = arith.constant 0 : index
    %c0_108 = arith.constant 0 : index
    %219 = vector.load %arg13[%c0_107, %c0_108] : memref<1x128xf32, #tpu.memory_space<vmem>>, vector<1x128xf32>
    %220 = vector.broadcast %219 : vector<1x128xf32> to vector<20x128xf32>
    %221 = arith.addf %218, %220 : vector<20x128xf32>
    %cst_109 = arith.constant -1.702000e+00 : f32
    %222 = vector.broadcast %cst_109 : f32 to vector<20x128xf32>
    %223 = arith.mulf %222, %221 : vector<20x128xf32>
    %224 = math.exp %223 : vector<20x128xf32>
    %cst_110 = arith.constant 1.000000e+00 : f32
    %225 = vector.broadcast %cst_110 : f32 to vector<20x128xf32>
    %226 = arith.addf %225, %224 : vector<20x128xf32>
    %cst_111 = arith.constant 1.000000e+00 : f32
    %227 = vector.broadcast %cst_111 : f32 to vector<20x128xf32>
    %228 = arith.divf %227, %226 : vector<20x128xf32>
    %229 = arith.mulf %221, %228 : vector<20x128xf32>
    %c0_112 = arith.constant 0 : index
    %c0_113 = arith.constant 0 : index
    %230 = vector.load %arg14[%c0_112, %c0_113] : memref<128x32xf32, #tpu.memory_space<vmem>>, vector<128x32xf32>
    %cst_114 = arith.constant dense<0.000000e+00> : vector<20x32xf32>
    %231 = tpu.matmul %229, %230, %cst_114 {dimension_numbers = #tpu.dot_dimension_numbers<[1], [0], [0], [1], [0, 0, 1, 1], [], []>} : vector<20x128xf32>, vector<128x32xf32>, vector<20x32xf32> -> vector<20x32xf32>
    %c0_115 = arith.constant 0 : index
    %c0_116 = arith.constant 0 : index
    %232 = vector.load %arg15[%c0_115, %c0_116] : memref<1x32xf32, #tpu.memory_space<vmem>>, vector<1x32xf32>
    %233 = vector.broadcast %232 : vector<1x32xf32> to vector<20x32xf32>
    %234 = arith.addf %231, %233 : vector<20x32xf32>
    %235 = arith.addf %194, %234 : vector<20x32xf32>
    %c0_117 = arith.constant 0 : index
    %c0_118 = arith.constant 0 : index
    %236 = vector.load %arg3[%c0_117, %c0_118] : memref<8x32xf32, #tpu.memory_space<vmem>>, vector<8x32xf32>
    %237 = tpu.iota {dimensions = array<i32: 0>} : vector<2x20xi32>
    %238 = arith.sitofp %237 : vector<2x20xi32> to vector<2x20xf32>
    %239 = tpu.iota {dimensions = array<i32: 1>} : vector<2x20xi32>
    %240 = arith.sitofp %239 : vector<2x20xi32> to vector<2x20xf32>
    %cst_119 = arith.constant 0.000000e+00 : f32
    %241 = vector.broadcast %cst_119 : f32 to vector<2x20xf32>
    %242 = arith.addf %238, %241 : vector<2x20xf32>
    %cst_120 = arith.constant 5.000000e+00 : f32
    %243 = vector.broadcast %cst_120 : f32 to vector<2x20xf32>
    %244 = arith.mulf %242, %243 : vector<2x20xf32>
    %245 = arith.cmpf oeq, %240, %244 : vector<2x20xf32>
    %246 = arith.extui %245 : vector<2x20xi1> to vector<2x20xi32>
    %247 = arith.sitofp %246 : vector<2x20xi32> to vector<2x20xf32>
    %248 = tpu.iota {dimensions = array<i32: 0>} : vector<2x20xi32>
    %249 = arith.sitofp %248 : vector<2x20xi32> to vector<2x20xf32>
    %250 = tpu.iota {dimensions = array<i32: 1>} : vector<2x20xi32>
    %251 = arith.sitofp %250 : vector<2x20xi32> to vector<2x20xf32>
    %cst_121 = arith.constant 2.000000e+00 : f32
    %252 = vector.broadcast %cst_121 : f32 to vector<2x20xf32>
    %253 = arith.addf %249, %252 : vector<2x20xf32>
    %cst_122 = arith.constant 5.000000e+00 : f32
    %254 = vector.broadcast %cst_122 : f32 to vector<2x20xf32>
    %255 = arith.mulf %253, %254 : vector<2x20xf32>
    %256 = arith.cmpf oeq, %251, %255 : vector<2x20xf32>
    %257 = arith.extui %256 : vector<2x20xi1> to vector<2x20xi32>
    %258 = arith.sitofp %257 : vector<2x20xi32> to vector<2x20xf32>
    %cst_123 = arith.constant dense<0.000000e+00> : vector<2x32xf32>
    %259 = tpu.matmul %247, %235, %cst_123 {dimension_numbers = #tpu.dot_dimension_numbers<[1], [0], [0], [1], [0, 0, 1, 1], [], []>} : vector<2x20xf32>, vector<20x32xf32>, vector<2x32xf32> -> vector<2x32xf32>
    %260 = vector.extract_strided_slice %236 {offsets = [6, 0], sizes = [1, 32], strides = [1, 1]} : vector<8x32xf32> to vector<1x32xf32>
    %261 = vector.extract_strided_slice %236 {offsets = [7, 0], sizes = [1, 32], strides = [1, 1]} : vector<8x32xf32> to vector<1x32xf32>
    %cst_124 = arith.constant dense<0.000000e+00> : vector<2xf32>
    %262 = vector.multi_reduction <add>, %259, %cst_124 [1] : vector<2x32xf32> to vector<2xf32>
    %263 = vector.shape_cast %262 : vector<2xf32> to vector<2x1xf32>
    %cst_125 = arith.constant 3.200000e+01 : f32
    %264 = vector.broadcast %cst_125 : f32 to vector<2x1xf32>
    %265 = arith.divf %263, %264 : vector<2x1xf32>
    %266 = vector.broadcast %265 : vector<2x1xf32> to vector<2x32xf32>
    %267 = arith.subf %259, %266 : vector<2x32xf32>
    %268 = arith.mulf %267, %267 : vector<2x32xf32>
    %cst_126 = arith.constant dense<0.000000e+00> : vector<2xf32>
    %269 = vector.multi_reduction <add>, %268, %cst_126 [1] : vector<2x32xf32> to vector<2xf32>
    %270 = vector.shape_cast %269 : vector<2xf32> to vector<2x1xf32>
    %cst_127 = arith.constant 3.200000e+01 : f32
    %271 = vector.broadcast %cst_127 : f32 to vector<2x1xf32>
    %272 = arith.divf %270, %271 : vector<2x1xf32>
    %273 = vector.broadcast %265 : vector<2x1xf32> to vector<2x32xf32>
    %274 = arith.subf %259, %273 : vector<2x32xf32>
    %cst_128 = arith.constant 9.99999974E-6 : f32
    %275 = vector.broadcast %cst_128 : f32 to vector<2x1xf32>
    %276 = arith.addf %272, %275 : vector<2x1xf32>
    %277 = math.rsqrt %276 : vector<2x1xf32>
    %278 = vector.broadcast %277 : vector<2x1xf32> to vector<2x32xf32>
    %279 = arith.mulf %274, %278 : vector<2x32xf32>
    %280 = vector.broadcast %260 : vector<1x32xf32> to vector<2x32xf32>
    %281 = arith.mulf %279, %280 : vector<2x32xf32>
    %282 = vector.broadcast %261 : vector<1x32xf32> to vector<2x32xf32>
    %283 = arith.addf %281, %282 : vector<2x32xf32>
    %cst_129 = arith.constant dense<0.000000e+00> : vector<2x32xf32>
    %284 = tpu.matmul %258, %235, %cst_129 {dimension_numbers = #tpu.dot_dimension_numbers<[1], [0], [0], [1], [0, 0, 1, 1], [], []>} : vector<2x20xf32>, vector<20x32xf32>, vector<2x32xf32> -> vector<2x32xf32>
    %285 = vector.extract_strided_slice %236 {offsets = [6, 0], sizes = [1, 32], strides = [1, 1]} : vector<8x32xf32> to vector<1x32xf32>
    %286 = vector.extract_strided_slice %236 {offsets = [7, 0], sizes = [1, 32], strides = [1, 1]} : vector<8x32xf32> to vector<1x32xf32>
    %cst_130 = arith.constant dense<0.000000e+00> : vector<2xf32>
    %287 = vector.multi_reduction <add>, %284, %cst_130 [1] : vector<2x32xf32> to vector<2xf32>
    %288 = vector.shape_cast %287 : vector<2xf32> to vector<2x1xf32>
    %cst_131 = arith.constant 3.200000e+01 : f32
    %289 = vector.broadcast %cst_131 : f32 to vector<2x1xf32>
    %290 = arith.divf %288, %289 : vector<2x1xf32>
    %291 = vector.broadcast %290 : vector<2x1xf32> to vector<2x32xf32>
    %292 = arith.subf %284, %291 : vector<2x32xf32>
    %293 = arith.mulf %292, %292 : vector<2x32xf32>
    %cst_132 = arith.constant dense<0.000000e+00> : vector<2xf32>
    %294 = vector.multi_reduction <add>, %293, %cst_132 [1] : vector<2x32xf32> to vector<2xf32>
    %295 = vector.shape_cast %294 : vector<2xf32> to vector<2x1xf32>
    %cst_133 = arith.constant 3.200000e+01 : f32
    %296 = vector.broadcast %cst_133 : f32 to vector<2x1xf32>
    %297 = arith.divf %295, %296 : vector<2x1xf32>
    %298 = vector.broadcast %290 : vector<2x1xf32> to vector<2x32xf32>
    %299 = arith.subf %284, %298 : vector<2x32xf32>
    %cst_134 = arith.constant 9.99999974E-6 : f32
    %300 = vector.broadcast %cst_134 : f32 to vector<2x1xf32>
    %301 = arith.addf %297, %300 : vector<2x1xf32>
    %302 = math.rsqrt %301 : vector<2x1xf32>
    %303 = vector.broadcast %302 : vector<2x1xf32> to vector<2x32xf32>
    %304 = arith.mulf %299, %303 : vector<2x32xf32>
    %305 = vector.broadcast %285 : vector<1x32xf32> to vector<2x32xf32>
    %306 = arith.mulf %304, %305 : vector<2x32xf32>
    %307 = vector.broadcast %286 : vector<1x32xf32> to vector<2x32xf32>
    %308 = arith.addf %306, %307 : vector<2x32xf32>
    %c0_135 = arith.constant 0 : index
    %c0_136 = arith.constant 0 : index
    %309 = vector.load %arg16[%c0_135, %c0_136] : memref<32x16xf32, #tpu.memory_space<vmem>>, vector<32x16xf32>
    %cst_137 = arith.constant dense<0.000000e+00> : vector<2x16xf32>
    %310 = tpu.matmul %283, %309, %cst_137 {dimension_numbers = #tpu.dot_dimension_numbers<[1], [0], [0], [1], [0, 0, 1, 1], [], []>} : vector<2x32xf32>, vector<32x16xf32>, vector<2x16xf32> -> vector<2x16xf32>
    %cst_138 = arith.constant dense<0.000000e+00> : vector<2x16xf32>
    %311 = tpu.matmul %308, %309, %cst_138 {dimension_numbers = #tpu.dot_dimension_numbers<[1], [0], [0], [1], [0, 0, 1, 1], [], []>} : vector<2x32xf32>, vector<32x16xf32>, vector<2x16xf32> -> vector<2x16xf32>
    %312 = arith.mulf %310, %311 : vector<2x16xf32>
    %cst_139 = arith.constant dense<0.000000e+00> : vector<2xf32>
    %313 = vector.multi_reduction <add>, %312, %cst_139 [1] : vector<2x16xf32> to vector<2xf32>
    %314 = vector.shape_cast %313 : vector<2xf32> to vector<2x1xf32>
    %315 = arith.mulf %310, %310 : vector<2x16xf32>
    %cst_140 = arith.constant dense<0.000000e+00> : vector<2xf32>
    %316 = vector.multi_reduction <add>, %315, %cst_140 [1] : vector<2x16xf32> to vector<2xf32>
    %317 = vector.shape_cast %316 : vector<2xf32> to vector<2x1xf32>
    %318 = math.sqrt %317 : vector<2x1xf32>
    %319 = arith.mulf %311, %311 : vector<2x16xf32>
    %cst_141 = arith.constant dense<0.000000e+00> : vector<2xf32>
    %320 = vector.multi_reduction <add>, %319, %cst_141 [1] : vector<2x16xf32> to vector<2xf32>
    %321 = vector.shape_cast %320 : vector<2xf32> to vector<2x1xf32>
    %322 = math.sqrt %321 : vector<2x1xf32>
    %cst_142 = arith.constant 9.99999993E-9 : f32
    %323 = vector.broadcast %cst_142 : f32 to vector<2x1xf32>
    %324 = arith.maximumf %318, %323 : vector<2x1xf32>
    %cst_143 = arith.constant 9.99999993E-9 : f32
    %325 = vector.broadcast %cst_143 : f32 to vector<2x1xf32>
    %326 = arith.maximumf %322, %325 : vector<2x1xf32>
    %327 = arith.mulf %324, %326 : vector<2x1xf32>
    %328 = arith.divf %314, %327 : vector<2x1xf32>
    %cst_144 = arith.constant dense<0.000000e+00> : vector<1xf32>
    %329 = vector.multi_reduction <add>, %328, %cst_144 [0] : vector<2x1xf32> to vector<1xf32>
    %330 = vector.shape_cast %329 : vector<1xf32> to vector<1x1xf32>
    %cst_145 = arith.constant 2.000000e+00 : f32
    %331 = vector.broadcast %cst_145 : f32 to vector<1x1xf32>
    %332 = arith.divf %330, %331 : vector<1x1xf32>
    %cst_146 = arith.constant 1.000000e+00 : f32
    %333 = vector.broadcast %cst_146 : f32 to vector<1x1xf32>
    %334 = arith.subf %333, %332 : vector<1x1xf32>
    %c0_147 = arith.constant 0 : index
    %c0_148 = arith.constant 0 : index
    %335 = vector.load %arg17[%c0_147, %c0_148] : memref<1x1xf32, #tpu.memory_space<vmem>>, vector<1x1xf32>
    tpu.vector_store %arg17[%c0_147, %c0_148], %334 {strides = array<i32>} : memref<1x1xf32, #tpu.memory_space<vmem>>, vector<1x1xf32>,
    return
  }
}

</mosaic_0001>

<bundles_post_ra>
// kernel: a_call__.1
= control target key start
LH: loop header
LB: loop body
LE: loop exit
PB: predicated region body
PF: predicated region fallthrough
CT: control target
= control target key end

     0   :  { %s4967_s0 = inlined_call_operand.vmem [shape: f32[20,192], index: 0, kind: input, shape index: {}]   ;;  %s4968_s1 = inlined_call_operand.vmem [shape: f32[192,32], index: 1, kind: input, shape index: {}]   ;;  %s4969_s2 = inlined_call_operand.vmem [shape: f32[5,32], index: 2, kind: input, shape index: {}]   ;;  %s4970_s3 = inlined_call_operand.vmem [shape: f32[8,32], index: 3, kind: input, shape index: {}]   ;;  %s4971_s4 = inlined_call_operand.vmem [shape: f32[32,32], index: 4, kind: input, shape index: {}]   ;;  %s4972_s5 = inlined_call_operand.vmem [shape: f32[1,32], index: 5, kind: input, shape index: {}, may-alias: {5,9,11,15}]   ;;  %s4973_s6 = inlined_call_operand.vmem [shape: f32[32,32], index: 6, kind: input, shape index: {}]   ;;  %s4974_s7 = inlined_call_operand.vmem [shape: f32[32,1], index: 7, kind: input, shape index: {}]   ;;  %s4975_s8 = inlined_call_operand.vmem [shape: f32[32,32], index: 8, kind: input, shape index: {}]   ;;  %s4976_s9 = inlined_call_operand.vmem [shape: f32[1,32], index: 9, kind: input, shape index: {}, may-alias: {5,9,11,15}]   ;;  %s4977_s10 = inlined_call_operand.vmem [shape: f32[32,32], index: 10, kind: input, shape index: {}]   ;;  %s4978_s11 = inlined_call_operand.vmem [shape: f32[1,32], index: 11, kind: input, shape index: {}, may-alias: {5,9,11,15}]   ;;  %s4979_s12 = inlined_call_operand.vmem [shape: f32[32,128], index: 12, kind: input, shape index: {}]   ;;  %s4980_s13 = inlined_call_operand.vmem [shape: f32[1,128], index: 13, kind: input, shape index: {}]   ;;  %s4981_s14 = inlined_call_operand.vmem [shape: f32[128,32], index: 14, kind: input, shape index: {}]   ;;  %s4982_s15 = inlined_call_operand.vmem [shape: f32[1,32], index: 15, kind: input, shape index: {}, may-alias: {5,9,11,15}]   ;;  %s4983_s16 = inlined_call_operand.vmem [shape: f32[32,16], index: 16, kind: input, shape index: {}]   ;;  %s4984_s17 = inlined_call_operand.hbm [shape: f32[1,1], index: 17, kind: output, shape index: {}]  }
   0x1   :  { %4987 = sst [smem:[#allocation5_spill]] %s4967_s0 }
   0x2   :  { %4988 = sst [smem:[#allocation6_spill]] %s4968_s1 }
   0x3   :  { %s4989_s26 = sld [smem:[#allocation6_spill]]  ;;  %v3942_v1 = vmov 0.0   ;;  %vm102_vm0 = vcmask 523264  }
   0x4   :  { %112 = vmatprep.subr.mxu0 %v3942_v1  ;;  %s4990_s22 = sld [smem:[#allocation5_spill]] }
   0x9   :  { %v79_v0 = vld [vmem:[%s4989_s26 + $0x78] sm:$0xff]  ;;  %v78_v2 = vld [vmem:[%s4989_s26 + $0x70] sm:$0xff]  ;;  %v77_v3 = vld [vmem:[%s4989_s26 + $0x68] sm:$0xff] }
   0xa   :  { %113 = vmatpush1.msra.mxu0 %v79_v0  ;;  %v76_v4 = vld [vmem:[%s4989_s26 + $0x60] sm:$0xff]  ;;  %v75_v5 = vld [vmem:[%s4989_s26 + $0x58] sm:$0xff]  ;;  %v59_v6 = vld [vmem:[%s4990_s22 + $0x8] sm:$0xff] }
   0xb   :  { %114 = vmatprep.subr.mxu0 %v3942_v1  ;;  %v74_v7 = vld [vmem:[%s4989_s26 + $0x50] sm:$0xff]  ;;  %3172 = vmatprep.mubr.msk.f32.mxu0 %vm102_vm0, %v59_v6 }
   0xc   :  { %115 = vmatpush1.msra.mxu0 %v78_v2 }
   0xd   :  { %116 = vmatprep.subr.mxu0 %v3942_v1 }
   0xe   :  { %117 = vmatpush1.msra.mxu0 %v77_v3 }
   0xf   :  { %118 = vmatprep.subr.mxu0 %v3942_v1 }
  0x10   :  { %119 = vmatpush1.msra.mxu0 %v76_v4 }
  0x11   :  { %120 = vmatprep.subr.mxu0 %v3942_v1 }
  0x12   :  { %121 = vmatpush1.msra.mxu0 %v75_v5 }
  0x13   :  { %22 = vsyncpa [#allocation3], 0  ;;  %122 = vmatprep.subr.mxu0 %v3942_v1  ;;  %v73_v8 = vld [vmem:[%s4989_s26 + $0x48] sm:$0xff]  ;;  %v72_v9 = vld [vmem:[%s4989_s26 + $0x40] sm:$0xff]  ;;  %vm96_vm1 = vcmask 1044480   ;;  %vm192_vm2 = vcmask 261120  }
  0x14   :  { %123 = vmatpush1.msra.mxu0 %v74_v7  ;;  %v71_v10 = vld [vmem:[%s4989_s26 + $0x38] sm:$0xff]  ;;  %v70_v11 = vld [vmem:[%s4989_s26 + $0x30] sm:$0xff]  ;;  %v69_v12 = vld [vmem:[%s4989_s26 + $0x28] sm:$0xff]  ;;  %vm98_vm3 = vcmask 1041408   ;;  %vm100_vm4 = vcmask 1046528   ;;  %vm199_vm5 = vcmask 257024  }
  0x15   :  { %124 = vmatprep.subr.mxu0 %v3942_v1  ;;  %v68_v13 = vld [vmem:[%s4989_s26 + $0x20] sm:$0xff]  ;;  %v67_v14 = vld [vmem:[%s4989_s26 + $0x18] sm:$0xff]  ;;  %v66_v15 = vld [vmem:[%s4989_s26 + $0x10] sm:$0xff]  ;;  %s3943_s21 = smov 120   ;;  %vm3944_vm6 = vmmov 0   ;;  %vm645_vm7 = vcmask 64512  }
  0x16   :  { %125 = vmatpush1.msra.mxu0 %v73_v8  ;;  %v65_v16 = vld [vmem:[%s4989_s26 + $0x8] sm:$0xff]  ;;  %v64_v17 = vld [vmem:[%s4989_s26] sm:$0xff]  ;;  %v87_v18 = vld [vmem:[%s4989_s26 + $0xb8] sm:$0xff]  ;;  %vm785_vm8 = vcmask 1043456   ;;  %vm741_vm11 = vcmask 162816   ;;  %vm748_vm13 = vcmask 158720  }
  0x17   :  { %126 = vmatprep.subr.mxu0 %v3942_v1  ;;  %v86_v19 = vld [vmem:[%s4989_s26 + $0xb0] sm:$0xff]  ;;  %v85_v20 = vld [vmem:[%s4989_s26 + $0xa8] sm:$0xff]  ;;  %v84_v21 = vld [vmem:[%s4989_s26 + $0xa0] sm:$0xff]  ;;  %s3948_s25 = smov 104  }
  0x18   :  { %127 = vmatpush1.msra.mxu0 %v72_v9  ;;  %v83_v22 = vld [vmem:[%s4989_s26 + $0x98] sm:$0xff]  ;;  %v82_v23 = vld [vmem:[%s4989_s26 + $0x90] sm:$0xff]  ;;  %v81_v24 = vld [vmem:[%s4989_s26 + $0x88] sm:$0xff]  ;;  %v234_v9 = vlaneseq }
  0x19   :  { %128 = vmatprep.subr.mxu0 %v3942_v1  ;;  %v80_v25 = vld [vmem:[%s4989_s26 + $0x80] sm:$0xff]  ;;  %v61_v27 = vld [vmem:[%s4990_s22 + $0x18] sm:$0xff]  ;;  %v60_v28 = vld [vmem:[%s4990_s22 + $0x10] sm:$0xff] }
  0x1a   :  { %129 = vmatpush1.msra.mxu0 %v71_v10  ;;  %v58_v26 = vld [vmem:[%s4990_s22] sm:$0xff]  ;;  %v63_v29 = vld [vmem:[%s4990_s22 + $0x28] sm:$0xf] }
  0x1b   :  { %130 = vmatprep.subr.mxu0 %v3942_v1  ;;  %v62_v30 = vld [vmem:[%s4990_s22 + $0x20] sm:$0xf]  ;;  %s3947_s22 = smov 112  }
  0x1c   :  { %131 = vmatpush1.msra.mxu0 %v70_v11  ;;  %v88_v31 = vld [vmem:[%s4969_s2] sm:$0x1f] }
  0x1d   :  { %132 = vmatprep.subr.mxu0 %v3942_v1  ;;  %v90_v32 = vrot.slane %v88_v31, 3  ;;  %v92_v36 = vrot.slane %v88_v31, 6  ;;  %v94_v39 = vrot.slane %v88_v31, 1 }
  0x1e   :  { %133 = vmatpush1.msra.mxu0 %v69_v12  ;;  %v4169_v12 = vshrl.u32 %v234_v9, 7 }
  0x1f   :  { %134 = vmatprep.subr.mxu0 %v3942_v1  ;;  %v97_v33 = vsel %vm96_vm1, %v88_v31, %v90_v32  ;;  %v99_v41 = vsel %vm98_vm3, %v90_v32, %v92_v36  ;;  %vm3115_vm1 = vcmask 123904  }
  0x20   :  { %135 = vmatpush1.msra.mxu0 %v68_v13  ;;  %v101_v43 = vsel %vm100_vm4, %v99_v41, %v94_v39  ;;  %v236_v13 = vsub.s32 0, %v4169_v12 }
  0x21   :  { %136 = vmatprep.subr.mxu0 %v3942_v1 }
  0x22   :  { %137 = vmatpush1.msra.mxu0 %v67_v14  ;;  %v4175_v14 = vld [vmem:[%s4970_s3] sm:$0xff] }
  0x23   :  { %138 = vmatprep.subr.mxu0 %v3942_v1 }
  0x24   :  { %139 = vmatpush1.msra.mxu0 %v66_v15  ;;  %v243_v15 = vsub.s32 1, %v4169_v12 }
  0x25   :  { %140 = vmatprep.subr.mxu0 %v3942_v1 }
  0x26   :  { %141 = vmatpush1.msra.mxu0 %v65_v16  ;;  %v237_v16 = vrot.slane %v4175_v14, %v236_v13 }
  0x27   :  { %142 = vmatprep.subr.mxu0 %v3942_v1 }
  0x28   :  { %143 = vmatpush1.msra.mxu0 %v64_v17 }
  0x29   :  { %160 = vmatprep.subr.mxu0 %v3942_v1 }
  0x2a   :  { %161 = vmatpush2.msra.mxu0 %v87_v18 }
  0x2b   :  { %162 = vmatprep.subr.mxu0 %v3942_v1 }
  0x2c   :  { %163 = vmatpush2.msra.mxu0 %v86_v19  ;;  %v244_v19 = vrot.slane %v4175_v14, %v243_v15 }
  0x2d   :  { %164 = vmatprep.subr.mxu0 %v3942_v1 }
  0x2e   :  { %165 = vmatpush2.msra.mxu0 %v85_v20 }
  0x2f   :  { %166 = vmatprep.subr.mxu0 %v3942_v1 }
  0x30   :  { %167 = vmatpush2.msra.mxu0 %v84_v21 }
  0x31   :  { %168 = vmatprep.subr.mxu0 %v3942_v1 }
  0x32   :  { %169 = vmatpush2.msra.mxu0 %v83_v22 }
  0x33   :  { %170 = vmatprep.subr.mxu0 %v3942_v1 }
  0x34   :  { %171 = vmatpush2.msra.mxu0 %v82_v23 }
  0x35   :  { %172 = vmatprep.subr.mxu0 %v3942_v1 }
  0x36   :  { %173 = vmatpush2.msra.mxu0 %v81_v24 }
  0x37   :  { %174 = vmatprep.subr.mxu0 %v3942_v1 }
  0x38   :  { %175 = vmatpush2.msra.mxu0 %v80_v25 }
  0x39   :  { %177 = vmatmul.mubr.f32.vlgmr.msra.gmra.mxu0 %v58_v26  ;;  %3497 = vmatprep.subr.mxu0 %v3942_v1 }
  0x3a   :  { %3173 = vmatprep.mubr.msk.f32.mxu0 %vm102_vm0, %v61_v27 }
  0x3d   :  { %182 = vmatmul.mubr.f32.gmra.mxu0 %v60_v28 }
  0x3e   :  { %3174 = vmatprep.mubr.msk.f32.mxu0 %vm102_vm0, %v63_v29  ;;  %vm2852_vm0 = vcmask 254976  }
  0x41   :  { %187 = vmatmul.mubr.f32.gmra.mxu0 %v62_v30 }
  0x42   :  { %3505 = vmatprep.mubr.msk.f32.mxu0 %vm3944_vm6, %v3942_v1 }
  0xf9   :  { %v178_v34 = vpop.f32.mrf.mxu0 }
  0xfa   :  { %v179_v35 = vadd.f32 %v178_v34, %v97_v33 }
  0xfb   :  { %v180_v37 = vpop.f32.mrf.mxu0 }
  0xfc   :  { %v193_v38 = vsel %vm192_vm2, %v179_v35, 0.0 }
  0xfd   :  { %v183_v40 = vpop.f32.mrf.mxu0  ;;  %194 = vadd.xlane.f32.xlu1 %v193_v38 }
  0xfe   :  { %v184_v47 = vadd.f32 %v183_v40, %v101_v43 }
  0xff   :  { %v185_v42 = vpop.f32.mrf.mxu0 }
 0x100   :  { %v196_v49 = vsel %vm192_vm2, %v184_v47, 0.0 }
 0x101   :  { %v188_v44 = vpop.f32.mrf.mxu0 }
 0x102   :  { %v189_v45 = vadd.f32 %v188_v44, %v94_v39 }
 0x103   :  { %v190_v46 = vpop.f32.mrf.mxu0 }
 0x104   :  { %v200_v48 = vsel %vm199_vm5, %v189_v45, 0.0 }
 0x105   :  { %201 = vadd.xlane.f32.xlu0 %v200_v48  ;;  %v4213_v48 = vld [vmem:[%s4971_s4 + $0x18] sm:$0xff] }
 0x109   :  { %197 = vadd.xlane.f32.xlu0 %v196_v49  ;;  %v4220_v49 = vld [vmem:[%s4971_s4 + $0x10] sm:$0xff] }
 0x186   :  { %v195_v50 = vpop.xlane.xlu1 %194 }
 0x187   :  { %v204_v51 = vmul.f32 0.03125, %v195_v50  ;;  %v4227_v50 = vld [vmem:[%s4971_s4 + $0x8] sm:$0xff] }
 0x189   :  { %v207_v54 = vsub.f32 %v179_v35, %v204_v51  ;;  %v4234_v51 = vld [vmem:[%s4971_s4] sm:$0xff] }
 0x18b   :  { %v210_v61 = vmul.f32 %v207_v54, %v207_v54 }
 0x18d   :  { %v213_v0 = vsel %vm192_vm2, %v210_v61, 0.0 }
 0x18e   :  { %v202_v52 = vpop.xlane.xlu0 %201 }
 0x18f   :  { %v206_v53 = vmul.f32 0.03125, %v202_v52  ;;  %v329_v52 = vld [vmem:[%s4973_s6] sm:$0xff] }
 0x190   :  { %3431 = vmatprep.mubr.msk.f32.mxu1 %vm192_vm2, %v329_v52 }
 0x191   :  { %v209_v55 = vsub.f32 %v189_v45, %v206_v53  ;;  %v334_v53 = vld [vmem:[%s4974_s7 + $0x8] sm:$0xff] }
 0x192   :  { %v198_v56 = vpop.xlane.xlu0 %197 }
 0x193   :  { %v205_v57 = vmul.f32 0.03125, %v198_v56  ;;  %v212_v58 = vmul.f32 %v209_v55, %v209_v55  ;;  %v4253_v56 = vld [vmem:[%s4972_s5] ss:$0 sm:$0xff] }
 0x195   :  { %v208_v59 = vsub.f32 %v184_v47, %v205_v57  ;;  %v219_v60 = vsel %vm199_vm5, %v212_v58, 0.0 }
 0x196   :  { %220 = vadd.xlane.f32.xlu1 %v219_v60 }
 0x197   :  { %v211_v62 = vmul.f32 %v208_v59, %v208_v59 }
 0x199   :  { %v216_v63 = vsel %vm192_vm2, %v211_v62, 0.0 }
 0x19a   :  { %217 = vadd.xlane.f32.xlu0 %v216_v63  ;;  %214 = vadd.xlane.f32.xlu1 %v213_v0 }
 0x21f   :  { %v221_v2 = vpop.xlane.xlu1 %220 }
 0x220   :  { %v224_v3 = vmul.f32 0.03125, %v221_v2 }
 0x222   :  { %v227_v4 = vadd.f32 1e-05, %v224_v3 }
 0x223   :  { %v218_v5 = vpop.xlane.xlu0 %217  ;;  %v215_v6 = vpop.xlane.xlu1 %214 }
 0x224   :  { %3829 = vrsqrt.f32 %v227_v4  ;;  %v223_v7 = vmul.f32 0.03125, %v218_v5  ;;  %v222_v8 = vmul.f32 0.03125, %v215_v6  ;;  %v317_v4 = vsub.s32 2, %v4169_v12 }
 0x225   :  { %v324_v6 = vsub.s32 3, %v4169_v12 }
 0x226   :  { %v226_v10 = vadd.f32 1e-05, %v223_v7  ;;  %v225_v11 = vadd.f32 1e-05, %v222_v8  ;;  %v318_v7 = vrot.slane %v4175_v14, %v317_v4 }
 0x228   :  { %3831 = vrsqrt.f32 %v226_v10 }
 0x229   :  { %3833 = vrsqrt.f32 %v225_v11  ;;  %v325_v11 = vrot.slane %v4175_v14, %v324_v6 }
 0x231   :  { %v3830_v17 = vpop.eup %3829 }
 0x232   :  { %v233_v18 = vmul.f32 %v3830_v17, %v209_v55  ;;  %v3945_v55 = vmov 0  }
 0x233   :  { %3828 = vset.pattern.permute.xlu1 %v3945_v55  ;;  %3827 = vset.pattern.permute.xlu0 %v3945_v55 }
 0x234   :  { %v240_v20 = vmul.f32 %v237_v16, %v233_v18 }
 0x235   :  { %v3832_v21 = vpop.eup %3831 }
 0x236   :  { %v3834_v22 = vpop.eup %3833  ;;  %v4180_v23 = vadd.f32 %v244_v19, %v240_v20  ;;  %v232_v24 = vmul.f32 %v3832_v21, %v208_v59 }
 0x237   :  { %v231_v25 = vmul.f32 %v3834_v22, %v207_v54  ;;  %v333_v54 = vld [vmem:[%s4974_s7] sm:$0xff] }
 0x238   :  { %v282_v26 = vsel %vm199_vm5, %v4180_v23, 0.0  ;;  %v239_v27 = vmul.f32 %v237_v16, %v232_v24 }
 0x239   :  { %283 = vadd.xlane.f32.xlu0 %v282_v26  ;;  %v238_v28 = vmul.f32 %v237_v16, %v231_v25  ;;  %v330_v26 = vld [vmem:[%s4973_s6 + $0x8] sm:$0xff] }
 0x23a   :  { %v4184_v29 = vadd.f32 %v244_v19, %v239_v27  ;;  %v331_v27 = vld [vmem:[%s4973_s6 + $0x10] sm:$0xff] }
 0x23b   :  { %v4186_v30 = vadd.f32 %v244_v19, %v238_v28  ;;  %v332_v28 = vld [vmem:[%s4973_s6 + $0x18] sm:$0xff] }
 0x23c   :  { %v279_v31 = vsel %vm192_vm2, %v4184_v29, 0.0 }
 0x23d   :  { %280 = vadd.xlane.f32.xlu1 %v279_v31  ;;  %v276_v32 = vsel %vm192_vm2, %v4186_v30, 0.0  ;;  %v4322_v31 = vld [vmem:[%s4975_s8 + $0x18] sm:$0xff] }
 0x23e   :  { %277 = vadd.xlane.f32.xlu0 %v276_v32  ;;  %v4331_v32 = vld [vmem:[%s4975_s8 + $0x10] sm:$0xff] }
 0x2c2   :  { %v284_v33 = vpop.xlane.xlu0 %283 }
 0x2c3   :  { %v287_v34 = vmul.f32 0.03125, %v284_v33  ;;  %v4340_v33 = vld [vmem:[%s4975_s8 + $0x8] sm:$0xff] }
 0x2c5   :  { %v4193_v35 = vsub.f32 %v4180_v23, %v287_v34  ;;  %v4349_v34 = vld [vmem:[%s4975_s8] sm:$0xff] }
 0x2c6   :  { %v281_v36 = vpop.xlane.xlu1 %280 }
 0x2c7   :  { %v286_v37 = vmul.f32 0.03125, %v281_v36  ;;  %v278_v38 = vpop.xlane.xlu0 %277  ;;  %v293_v39 = vmul.f32 %v4193_v35, %v4193_v35 }
 0x2c8   :  { %v285_v40 = vmul.f32 0.03125, %v278_v38 }
 0x2c9   :  { %v4198_v41 = vsub.f32 %v4184_v29, %v286_v37  ;;  %v300_v42 = vsel %vm199_vm5, %v293_v39, 0.0 }
 0x2ca   :  { %v4202_v43 = vsub.f32 %v4186_v30, %v285_v40  ;;  %301 = vadd.xlane.f32.xlu1 %v300_v42 }
 0x2cb   :  { %v292_v44 = vmul.f32 %v4198_v41, %v4198_v41 }
 0x2cc   :  { %v291_v45 = vmul.f32 %v4202_v43, %v4202_v43 }
 0x2cd   :  { %v297_v46 = vsel %vm192_vm2, %v292_v44, 0.0 }
 0x2ce   :  { %298 = vadd.xlane.f32.xlu0 %v297_v46  ;;  %v294_v47 = vsel %vm192_vm2, %v291_v45, 0.0 }
 0x2cf   :  { %295 = vadd.xlane.f32.xlu1 %v294_v47 }
 0x2e0   :  { %880 = vrot.lane.b32.xlu1 %v4213_v48, %s3943_s21 }
 0x2e4   :  { %878 = vrot.lane.b32.xlu1 %v4220_v49, %s3943_s21  ;;  %339 = vperm.xlu0 %3827, %v333_v54  }
 0x2e8   :  { %876 = vrot.lane.b32.xlu1 %v4227_v50, %s3943_s21 }
 0x2ec   :  { %874 = vrot.lane.b32.xlu1 %v4234_v51, %s3943_s21 }
 0x2f0   :  { %344 = vperm.xlu1 %3828, %v334_v53  }
 0x2f4   :  { %886 = vrot.lane.b32.xlu1 %v4253_v56, %s3943_s21 }
 0x353   :  { %v302_v57 = vpop.xlane.xlu1 %301 }
 0x354   :  { %v305_v58 = vmul.f32 0.03125, %v302_v57 }
 0x356   :  { %v308_v59 = vadd.f32 1e-05, %v305_v58 }
 0x357   :  { %v299_v60 = vpop.xlane.xlu0 %298 }
 0x358   :  { %3835 = vrsqrt.f32 %v308_v59  ;;  %v296_v61 = vpop.xlane.xlu1 %295  ;;  %v304_v62 = vmul.f32 0.03125, %v299_v60 }
 0x359   :  { %v303_v63 = vmul.f32 0.03125, %v296_v61 }
 0x35a   :  { %v307_v0 = vadd.f32 1e-05, %v304_v62 }
 0x35b   :  { %v306_v2 = vadd.f32 1e-05, %v303_v63 }
 0x35c   :  { %3837 = vrsqrt.f32 %v307_v0  ;;  %v881_v3 = vpop.permute.xlu1 %880 }
 0x35d   :  { %3839 = vrsqrt.f32 %v306_v2  ;;  %3498 = vmatpush3.msra.mxu0 %v881_v3 }
 0x35e   :  { %3499 = vmatprep.subr.mxu0 %v3942_v1 }
 0x35f   :  { %v340_v42 = vpop.permute.xlu0 %339 }
 0x360   :  { %v879_v5 = vpop.permute.xlu1 %878 }
 0x361   :  { %3500 = vmatpush3.msra.mxu0 %v879_v5 }
 0x362   :  { %3501 = vmatprep.subr.mxu0 %v3942_v1 }
 0x364   :  { %v877_v8 = vpop.permute.xlu1 %876 }
 0x365   :  { %v3836_v10 = vpop.eup %3835  ;;  %3502 = vmatpush3.msra.mxu0 %v877_v8  ;;  %v4403_v8 = vld [vmem:[%s4976_s9] ss:$0 sm:$0xff] }
 0x366   :  { %v314_v13 = vmul.f32 %v3836_v10, %v4193_v35  ;;  %3503 = vmatprep.subr.mxu0 %v3942_v1 }
 0x368   :  { %v321_v15 = vmul.f32 %v318_v7, %v314_v13  ;;  %v875_v16 = vpop.permute.xlu1 %874 }
 0x369   :  { %v3838_v17 = vpop.eup %3837  ;;  %3504 = vmatpush3.msra.mxu0 %v875_v16 }
 0x36a   :  { %v3840_v18 = vpop.eup %3839  ;;  %v4265_v19 = vadd.f32 %v325_v11, %v321_v15  ;;  %v313_v20 = vmul.f32 %v3838_v17, %v4198_v41  ;;  %3531 = vmatprep.subr.mxu0 %v3942_v1  ;;  %v265_v17 = vand.u32 127, %v234_v9 }
 0x36b   :  { %v312_v21 = vmul.f32 %v3840_v18, %v4202_v43  ;;  %v4414_v18 = vcvt.s32.f32 %v4169_v12 }
 0x36c   :  { %v320_v22 = vmul.f32 %v318_v7, %v313_v20  ;;  %3425 = vmatprep.subr.msk.mxu1 %vm192_vm2, %v4265_v19  ;;  %v345_v35 = vpop.permute.xlu1 %344  ;;  %v4416_v20 = vcvt.s32.f32 %v265_v17 }
 0x36d   :  { %v319_v14 = vmul.f32 %v318_v7, %v312_v21  ;;  %3426 = vmatpush3.xpose.msk.msra.mxu1 %vm192_vm2, %v4265_v19  ;;  %v250_v21 = vadd.s32 8, %v4169_v12 }
 0x36e   :  { %v4274_v24 = vadd.f32 %v325_v11, %v320_v22  ;;  %v255_v22 = vadd.f32 0.5, %v4414_v18 }
 0x36f   :  { %v4276_v25 = vadd.f32 %v325_v11, %v319_v14  ;;  %v267_v14 = vadd.f32 0.5, %v4416_v20 }
 0x370   :  { %3427 = vmatprep.subr.msk.mxu1 %vm192_vm2, %v4274_v24  ;;  %v887_v39 = vpop.permute.xlu1 %886 }
 0x371   :  { %3506 = vmatmul.mubr.msk.f32.vlgmr.msra.gmra.mxu0 %vm192_vm2, %v4276_v25  ;;  %3428 = vmatpush3.xpose.msk.msra.mxu1 %vm192_vm2, %v4274_v24 }
 0x372   :  { %3429 = vmatprep.subr.msk.mxu1 %vm192_vm2, %v4276_v25  ;;  %3508 = vmatprep.mubr.msk.f32.mxu0 %vm3944_vm6, %v3942_v1 }
 0x375   :  { %3509 = vmatmul.mubr.msk.f32.gmra.mxu0 %vm192_vm2, %v4274_v24  ;;  %3430 = vmatpush3.xpose.msk.msra.mxu1 %vm192_vm2, %v4276_v25 }
 0x376   :  { %3511 = vmatprep.mubr.msk.f32.mxu0 %vm3944_vm6, %v3942_v1  ;;  %3437 = vmatprep.subr.mxu1 %v3942_v1 }
 0x378   :  { %3432 = vmatmul.mubr.msk.f32.vlgmr.msra.gmra.mxu1 %vm192_vm2, %v330_v26  ;;  %v253_v26 = vcvt.s32.f32 %v250_v21 }
 0x379   :  { %3512 = vmatmul.mubr.msk.f32.gmra.mxu0 %vm192_vm2, %v4265_v19  ;;  %3438 = vmatpush3.msra.mxu1 %v4213_v48 }
 0x37a   :  { %3439 = vmatprep.subr.mxu1 %v3942_v1  ;;  %3434 = vmatprep.mubr.msk.f32.mxu1 %vm192_vm2, %v331_v27  ;;  %v251_v27 = vadd.s32 16, %v4169_v12 }
 0x37b   :  { %3440 = vmatpush3.msra.mxu1 %v4220_v49  ;;  %3533 = vmatprep.mubr.msk.f32.mxu0 %vm3944_vm6, %v3942_v1 }
 0x37c   :  { %3435 = vmatmul.mubr.msk.f32.gmra.mxu1 %vm192_vm2, %v332_v28  ;;  %3441 = vmatprep.subr.mxu1 %v3942_v1  ;;  %v258_v28 = vmul.f32 0.2, %v255_v22 }
 0x37d   :  { %3442 = vmatpush3.msra.mxu1 %v4227_v50  ;;  %3445 = vmatprep.mubr.msk.f32.mxu1 %vm3944_vm6, %v3942_v1 }
 0x37e   :  { %3443 = vmatprep.subr.mxu1 %v3942_v1 }
 0x37f   :  { %3444 = vmatpush3.msra.mxu1 %v4234_v51 }
 0x380   :  { %3446 = vmatmul.mubr.msk.f32.vlgmr.msra.gmra.mxu1 %vm192_vm2, %v4276_v25  ;;  %3454 = vmatprep.subr.mxu1 %v3942_v1 }
 0x381   :  { %3448 = vmatprep.mubr.msk.f32.mxu1 %vm3944_vm6, %v3942_v1  ;;  %3455 = vmatpush3.msra.mxu1 %v4322_v31 }
 0x382   :  { %3456 = vmatprep.subr.mxu1 %v3942_v1 }
 0x383   :  { %3457 = vmatpush3.msra.mxu1 %v4331_v32 }
 0x384   :  { %3449 = vmatmul.mubr.msk.f32.gmra.mxu1 %vm192_vm2, %v4274_v24  ;;  %3458 = vmatprep.subr.mxu1 %v3942_v1 }
 0x385   :  { %3451 = vmatprep.mubr.msk.f32.mxu1 %vm3944_vm6, %v3942_v1  ;;  %3459 = vmatpush3.msra.mxu1 %v4340_v33 }
 0x386   :  { %3460 = vmatprep.subr.mxu1 %v3942_v1 }
 0x387   :  { %3461 = vmatpush3.msra.mxu1 %v4349_v34 }
 0x388   :  { %3452 = vmatmul.mubr.msk.f32.gmra.mxu1 %vm192_vm2, %v4265_v19  ;;  %3471 = vmatprep.subr.mxu1 %v3942_v1 }
 0x389   :  { %3462 = vmatprep.mubr.msk.f32.mxu1 %vm3944_vm6, %v3942_v1 }
 0x38c   :  { %3463 = vmatmul.mubr.msk.f32.vlgmr.msra.gmra.mxu1 %vm192_vm2, %v4276_v25 }
 0x38d   :  { %3465 = vmatprep.mubr.msk.f32.mxu1 %vm3944_vm6, %v3942_v1 }
 0x390   :  { %3466 = vmatmul.mubr.msk.f32.gmra.mxu1 %vm192_vm2, %v4274_v24 }
 0x391   :  { %3468 = vmatprep.mubr.msk.f32.mxu1 %vm3944_vm6, %v3942_v1 }
 0x394   :  { %3469 = vmatmul.mubr.msk.f32.gmra.mxu1 %vm192_vm2, %v4265_v19 }
 0x395   :  { %3473 = vmatprep.mubr.msk.f32.mxu1 %vm3944_vm6, %v3942_v1 }
 0x431   :  { %v955_v36 = vpop.f32.mrf.mxu0 }
 0x432   :  { %v956_v45 = vadd.f32 %v955_v36, %v887_v39  ;;  %v256_v36 = vadd.f32 0.5, %v253_v26 }
 0x433   :  { %v3507_v37 = vpop.f32.mrf.mxu0 }
 0x434   :  { %v254_v37 = vcvt.s32.f32 %v251_v27 }
 0x435   :  { %v960_v38 = vpop.f32.mrf.mxu0 }
 0x436   :  { %v961_v54 = vadd.f32 %v960_v38, %v887_v39 }
 0x437   :  { %v3510_v40 = vpop.f32.mrf.mxu0 }
 0x438   :  { %v3433_v41 = vpop.f32.mrf.mxu1 }
 0x439   :  { %v450_v43 = vadd.f32 %v3433_v41, %v345_v35  ;;  %v965_v44 = vpop.f32.mrf.mxu0  ;;  %v268_v35 = vmul.f32 0.2, %v267_v14  ;;  %v259_v41 = vmul.f32 0.2, %v256_v36 }
 0x43a   :  { %v444_v46 = vpop.f32.mrf.mxu1  ;;  %v966_v59 = vadd.f32 %v965_v44, %v887_v39  ;;  %v261_v39 = vfloor.f32 %v258_v28 }
 0x43b   :  { %v3513_v47 = vpop.f32.mrf.mxu0  ;;  %v445_v52 = vadd.f32 %v444_v46, %v340_v42  ;;  %3532 = vmatpush3.msra.mxu0 %v450_v43  ;;  %v269_v40 = vfloor.f32 %v268_v35  ;;  %v257_v42 = vadd.f32 0.5, %v254_v37 }
 0x43c   :  { %v4373_v53 = vpop.f32.mrf.mxu1  ;;  %3534 = vmatmul.mubr.msk.f32.vlgmr.msra.gmra.mxu0 %vm645_vm7, %v956_v45  ;;  %3557 = vmatprep.subr.mxu0 %v3942_v1  ;;  %v262_v45 = vfloor.f32 %v259_v41 }
 0x43d   :  { %3472 = vmatpush3.msra.mxu1 %v445_v52  ;;  %3536 = vmatprep.mubr.msk.f32.mxu0 %vm3944_vm6, %v3942_v1  ;;  %vm270_vm9 = vcmp.eq.f32.partialorder %v261_v39, %v269_v40  ;;  %v260_v46 = vmul.f32 0.2, %v257_v42 }
 0x43e   :  { %v4379_v55 = vpop.f32.mrf.mxu1  ;;  %3482 = vmatprep.subr.mxu1 %v3942_v1  ;;  %vm271_vm10 = vcmp.eq.f32.partialorder %v262_v45, %v269_v40 }
 0x440   :  { %v540_v57 = vpop.f32.mrf.mxu1  ;;  %3537 = vmatmul.mubr.msk.f32.gmra.mxu0 %vm645_vm7, %v961_v54 }
 0x441   :  { %v541_v58 = vadd.f32 %v4253_v56, %v540_v57  ;;  %3539 = vmatprep.mubr.msk.f32.mxu0 %vm3944_vm6, %v3942_v1 }
 0x442   :  { %v3447_v60 = vpop.f32.mrf.mxu1 }
 0x443   :  { %3474 = vmatmul.mubr.msk.f32.vlgmr.msra.gmra.mxu1 %vm645_vm7, %v541_v58  ;;  %v3946_v58 = vmov -1e+09  }
 0x444   :  { %v545_v61 = vpop.f32.mrf.mxu1  ;;  %3540 = vmatmul.mubr.msk.f32.gmra.mxu0 %vm645_vm7, %v966_v59  ;;  %3476 = vmatprep.mubr.msk.f32.mxu1 %vm3944_vm6, %v3942_v1  ;;  %v4424_v59 = vsel %vm270_vm9, 0.0, %v3946_v58 }
 0x445   :  { %v546_v62 = vadd.f32 %v4253_v56, %v545_v61  ;;  %3559 = vmatprep.mubr.msk.f32.mxu0 %vm3944_vm6, %v3942_v1 }
 0x446   :  { %v3450_v63 = vpop.f32.mrf.mxu1 }
 0x447   :  { %3477 = vmatmul.mubr.msk.f32.gmra.mxu1 %vm645_vm7, %v546_v62  ;;  %v263_v62 = vfloor.f32 %v260_v46 }
 0x448   :  { %v550_v0 = vpop.f32.mrf.mxu1  ;;  %3479 = vmatprep.mubr.msk.f32.mxu1 %vm3944_vm6, %v3942_v1 }
 0x449   :  { %v551_v2 = vadd.f32 %v4253_v56, %v550_v0  ;;  %vm272_vm12 = vcmp.eq.f32.partialorder %v263_v62, %v269_v40 }
 0x44a   :  { %v3453_v3 = vpop.f32.mrf.mxu1 }
 0x44b   :  { %3480 = vmatmul.mubr.msk.f32.gmra.mxu1 %vm645_vm7, %v551_v2 }
 0x44c   :  { %v631_v4 = vpop.f32.mrf.mxu1  ;;  %3488 = vmatprep.mubr.msk.f32.mxu1 %vm3944_vm6, %v3942_v1 }
 0x44d   :  { %v632_v16 = vadd.f32 %v4403_v8, %v631_v4  ;;  %v4428_v4 = vsel %vm271_vm10, 0.0, %v3946_v58 }
 0x44e   :  { %v3464_v5 = vpop.f32.mrf.mxu1 }
 0x450   :  { %v636_v6 = vpop.f32.mrf.mxu1 }
 0x451   :  { %v637_v15 = vadd.f32 %v4403_v8, %v636_v6 }
 0x452   :  { %v3467_v7 = vpop.f32.mrf.mxu1 }
 0x454   :  { %v641_v10 = vpop.f32.mrf.mxu1 }
 0x455   :  { %v642_v11 = vadd.f32 %v4403_v8, %v641_v10 }
 0x456   :  { %v3470_v13 = vpop.f32.mrf.mxu1 }
 0x457   :  { %3483 = vmatpush3.msk.msra.mxu1 %vm785_vm8, %v642_v11  ;;  %v4432_v13 = vsel %vm272_vm12, 0.0, %v3946_v58 }
 0x458   :  { %3484 = vmatprep.subr.mxu1 %v3942_v1 }
 0x459   :  { %3485 = vmatpush3.msra.mxu1 %v637_v15 }
 0x45a   :  { %3486 = vmatprep.subr.mxu1 %v3942_v1 }
 0x45b   :  { %3487 = vmatpush3.msra.mxu1 %v632_v16 }
 0x45c   :  { %3514 = vmatprep.subr.mxu1 %v3942_v1 }
 0x4fc   :  { %v4422_v38 = vpop.f32.mrf.mxu0 }
 0x4fe   :  { %v3535_v9 = vpop.f32.mrf.mxu0 }
 0x500   :  { %v1148_v43 = vpop.f32.mrf.mxu0 }
 0x501   :  { %v1158_v45 = vmul.f32 0.35355338, %v1148_v43 }
 0x502   :  { %v3538_v44 = vpop.f32.mrf.mxu0 }
 0x503   :  { %v721_v47 = vpop.f32.mrf.mxu1  ;;  %v1157_v44 = vmul.f32 0.35355338, %v4422_v38 }
 0x504   :  { %v735_v52 = vmul.f32 0.35355338, %v721_v47  ;;  %v1153_v54 = vpop.f32.mrf.mxu0  ;;  %v1161_v47 = vadd.f32 %v1158_v45, %v4428_v4 }
 0x505   :  { %v3475_v57 = vpop.f32.mrf.mxu1  ;;  %v1159_v46 = vmul.f32 0.35355338, %v1153_v54 }
 0x506   :  { %v3541_v60 = vpop.f32.mrf.mxu0  ;;  %v738_v61 = vadd.f32 %v735_v52, %v4424_v59  ;;  %v1160_v52 = vadd.f32 %v1157_v44, %v4424_v59  ;;  %v1166_v57 = vsel %vm741_vm11, %v1161_v47, -inf }
 0x507   :  { %v726_v63 = vpop.f32.mrf.mxu1  ;;  %v1162_v60 = vadd.f32 %v1159_v46, %v4432_v13 }
 0x508   :  { %v736_v0 = vmul.f32 0.35355338, %v726_v63  ;;  %v742_v2 = vsel %vm741_vm11, %v738_v61, -inf  ;;  %v1163_v58 = vsel %vm741_vm11, %v1160_v52, -inf }
 0x509   :  { %743 = vmax.xlane.f32.xlu1 %v742_v2  ;;  %v3478_v3 = vpop.f32.mrf.mxu1 }
 0x50a   :  { %v739_v5 = vadd.f32 %v736_v0, %v4428_v4 }
 0x50b   :  { %v731_v6 = vpop.f32.mrf.mxu1 }
 0x50c   :  { %v737_v7 = vmul.f32 0.35355338, %v731_v6  ;;  %v745_v10 = vsel %vm741_vm11, %v739_v5, -inf }
 0x50d   :  { %746 = vmax.xlane.f32.xlu0 %v745_v10  ;;  %v3481_v11 = vpop.f32.mrf.mxu1 }
 0x50e   :  { %v740_v15 = vadd.f32 %v737_v7, %v4432_v13 }
 0x510   :  { %v749_v16 = vsel %vm748_vm13, %v740_v15, -inf }
 0x511   :  { %750 = vmax.xlane.f32.xlu1 %v749_v16 }
 0x522   :  { %979 = vrot.lane.b32.xlu1 %v4322_v31, %s3943_s21 }
 0x592   :  { %v744_v17 = vpop.xlane.xlu1 %743 }
 0x593   :  { %v752_v21 = vsub.f32 %v738_v61, %v744_v17  ;;  %v1169_v61 = vsel %vm748_vm13, %v1162_v60, -inf }
 0x595   :  { %v755_v22 = vmul.f32 1.442695, %v752_v21 }
 0x596   :  { %v747_v14 = vpop.xlane.xlu0 %746 }
 0x597   :  { %3841 = vpow2.f32 %v755_v22  ;;  %v753_v26 = vsub.f32 %v739_v5, %v747_v14 }
 0x599   :  { %v757_v27 = vmul.f32 1.442695, %v753_v26 }
 0x59a   :  { %v751_v28 = vpop.xlane.xlu1 %750 }
 0x59b   :  { %3843 = vpow2.f32 %v757_v27  ;;  %v754_v35 = vsub.f32 %v740_v15, %v751_v28 }
 0x59d   :  { %v759_v36 = vmul.f32 1.442695, %v754_v35 }
 0x59e   :  { %v980_v62 = vpop.permute.xlu1 %979 }
 0x59f   :  { %3845 = vpow2.f32 %v759_v36 }
 0x5a4   :  { %v3842_v37 = vpop.eup %3841 }
 0x5a5   :  { %v761_v9 = vsel %vm741_vm11, %v3842_v37, 0.0 }
 0x5a6   :  { %762 = vadd.xlane.f32.xlu0 %v761_v9 }
 0x5a8   :  { %v3844_v39 = vpop.eup %3843 }
 0x5a9   :  { %v764_v40 = vsel %vm741_vm11, %v3844_v39, 0.0 }
 0x5aa   :  { %765 = vadd.xlane.f32.xlu1 %v764_v40 }
 0x5ac   :  { %v3846_v41 = vpop.eup %3845 }
 0x5ad   :  { %v767_v42 = vsel %vm748_vm13, %v3846_v41, 0.0 }
 0x5ae   :  { %768 = vadd.xlane.f32.xlu0 %v767_v42  ;;  %v1288_v42 = vld [vmem:[%s4977_s10 + $0x8] sm:$0xff] }
 0x5af   :  { %3558 = vmatpush3.msra.mxu0 %v1288_v42 }
 0x5b0   :  { %3579 = vmatprep.subr.mxu0 %v3942_v1 }
 0x5bb   :  { %975 = vrot.lane.b32.xlu1 %v4340_v33, %s3943_s21 }
 0x5bf   :  { %973 = vrot.lane.b32.xlu1 %v4349_v34, %s3943_s21 }
 0x5c4   :  { %977 = vrot.lane.b32.xlu0 %v4331_v32, %s3943_s21 }
 0x5e3   :  { %1167 = vmax.xlane.f32.xlu1 %v1166_v57  ;;  %1164 = vmax.xlane.f32.xlu0 %v1163_v58 }
 0x5e7   :  { %1170 = vmax.xlane.f32.xlu0 %v1169_v61 }
 0x62f   :  { %v763_v63 = vpop.xlane.xlu0 %762 }
 0x630   :  { %3847 = vrcp.f32 %v763_v63 }
 0x633   :  { %v766_v38 = vpop.xlane.xlu1 %765 }
 0x634   :  { %3849 = vrcp.f32 %v766_v38 }
 0x637   :  { %v769_v43 = vpop.xlane.xlu0 %768  ;;  %v976_v2 = vpop.permute.xlu1 %975 }
 0x638   :  { %3851 = vrcp.f32 %v769_v43 }
 0x63b   :  { %v978_v5 = vpop.permute.xlu0 %977  ;;  %v974_v10 = vpop.permute.xlu1 %973 }
 0x63d   :  { %v3848_v54 = vpop.eup %3847 }
 0x63e   :  { %v771_v0 = vmul.f32 %v3848_v54, %v3842_v37 }
 0x640   :  { %3489 = vmatmul.mubr.msk.f32.vlgmr.msra.gmra.mxu1 %vm741_vm11, %v771_v0 }
 0x641   :  { %v3850_v3 = vpop.eup %3849  ;;  %3515 = vmatpush3.msra.mxu1 %v980_v62  ;;  %3491 = vmatprep.mubr.msk.f32.mxu1 %vm3944_vm6, %v3942_v1 }
 0x642   :  { %3516 = vmatprep.subr.mxu1 %v3942_v1  ;;  %v773_v6 = vmul.f32 %v3850_v3, %v3844_v39 }
 0x643   :  { %3517 = vmatpush3.msra.mxu1 %v978_v5 }
 0x644   :  { %3518 = vmatprep.subr.mxu1 %v3942_v1  ;;  %3492 = vmatmul.mubr.msk.f32.gmra.mxu1 %vm741_vm11, %v773_v6 }
 0x645   :  { %v3852_v7 = vpop.eup %3851  ;;  %3519 = vmatpush3.msra.mxu1 %v976_v2  ;;  %3494 = vmatprep.mubr.msk.f32.mxu1 %vm3944_vm6, %v3942_v1 }
 0x646   :  { %3520 = vmatprep.subr.mxu1 %v3942_v1  ;;  %v775_v11 = vmul.f32 %v3852_v7, %v3846_v41  ;;  %v335_v41 = vld [vmem:[%s4974_s7 + $0x10] sm:$0xff] }
 0x647   :  { %3521 = vmatpush3.msra.mxu1 %v974_v10 }
 0x648   :  { %3495 = vmatmul.mubr.msk.f32.gmra.mxu1 %vm741_vm11, %v775_v11  ;;  %3542 = vmatprep.subr.mxu1 %v3942_v1 }
 0x649   :  { %3522 = vmatprep.mubr.msk.f32.mxu1 %vm3944_vm6, %v3942_v1 }
 0x64c   :  { %3523 = vmatmul.mubr.msk.f32.vlgmr.msra.gmra.mxu1 %vm192_vm2, %v4276_v25 }
 0x64d   :  { %3525 = vmatprep.mubr.msk.f32.mxu1 %vm3944_vm6, %v3942_v1 }
 0x650   :  { %3526 = vmatmul.mubr.msk.f32.gmra.mxu1 %vm192_vm2, %v4274_v24 }
 0x651   :  { %3528 = vmatprep.mubr.msk.f32.mxu1 %vm3944_vm6, %v3942_v1 }
 0x654   :  { %3529 = vmatmul.mubr.msk.f32.gmra.mxu1 %vm192_vm2, %v4265_v19 }
 0x655   :  { %3548 = vmatprep.mubr.msk.f32.mxu1 %vm3944_vm6, %v3942_v1 }
 0x66c   :  { %v1165_v15 = vpop.xlane.xlu0 %1164  ;;  %v1168_v16 = vpop.xlane.xlu1 %1167 }
 0x66d   :  { %v1172_v17 = vsub.f32 %v1160_v52, %v1165_v15  ;;  %v1173_v21 = vsub.f32 %v1161_v47, %v1168_v16 }
 0x66f   :  { %v1175_v22 = vmul.f32 1.442695, %v1172_v17  ;;  %v1177_v14 = vmul.f32 1.442695, %v1173_v21  ;;  %v869_v17 = vld [vmem:[%s4977_s10] sm:$0xff] }
 0x670   :  { %v1171_v26 = vpop.xlane.xlu0 %1170 }
 0x671   :  { %3853 = vpow2.f32 %v1175_v22  ;;  %v1174_v27 = vsub.f32 %v1162_v60, %v1171_v26 }
 0x672   :  { %3855 = vpow2.f32 %v1177_v14 }
 0x673   :  { %v1179_v28 = vmul.f32 1.442695, %v1174_v27 }
 0x675   :  { %3857 = vpow2.f32 %v1179_v28 }
 0x67e   :  { %v3854_v35 = vpop.eup %3853 }
 0x67f   :  { %v4479_v36 = vpop.eup %3855  ;;  %v1181_v37 = vsel %vm741_vm11, %v3854_v35, 0.0 }
 0x680   :  { %1182 = vadd.xlane.f32.xlu0 %v1181_v37  ;;  %v1184_v9 = vsel %vm741_vm11, %v4479_v36, 0.0 }
 0x681   :  { %1185 = vadd.xlane.f32.xlu1 %v1184_v9 }
 0x682   :  { %v4484_v39 = vpop.eup %3857 }
 0x683   :  { %v1187_v40 = vsel %vm748_vm13, %v4484_v39, 0.0 }
 0x684   :  { %1188 = vadd.xlane.f32.xlu0 %v1187_v40 }
 0x692   :  { %985 = vrot.lane.b32.xlu1 %v4403_v8, %s3943_s21 }
 0x696   :  { %1471 = vrot.lane.b32.xlu1 %v4220_v49, %s3947_s22 }
 0x69a   :  { %1469 = vrot.lane.b32.xlu1 %v4227_v50, %s3947_s22  ;;  %1473 = vrot.lane.b32.xlu0 %v4213_v48, %s3947_s22 }
 0x69e   :  { %349 = vperm.xlu1 %3828, %v335_v41   ;;  %1467 = vrot.lane.b32.xlu0 %v4234_v51, %s3947_s22 }
 0x6a2   :  { %1479 = vrot.lane.b32.xlu0 %v4253_v56, %s3947_s22  ;;  %1568 = vrot.lane.b32.xlu1 %v4322_v31, %s3947_s22 }
 0x6a6   :  { %1566 = vrot.lane.b32.xlu0 %v4331_v32, %s3947_s22  ;;  %1564 = vrot.lane.b32.xlu1 %v4340_v33, %s3947_s22 }
 0x6aa   :  { %1562 = vrot.lane.b32.xlu0 %v4349_v34, %s3947_s22 }
 0x700   :  { %v855_v51 = vpop.f32.mrf.mxu1 }
 0x702   :  { %v3490_v44 = vpop.f32.mrf.mxu1 }
 0x704   :  { %v860_v45 = vpop.f32.mrf.mxu1 }
 0x706   :  { %v3493_v46 = vpop.f32.mrf.mxu1 }
 0x708   :  { %v865_v47 = vpop.f32.mrf.mxu1 }
 0x709   :  { %v1183_v52 = vpop.xlane.xlu0 %1182 }
 0x70a   :  { %3859 = vrcp.f32 %v1183_v52  ;;  %v1186_v57 = vpop.xlane.xlu1 %1185  ;;  %v3496_v58 = vpop.f32.mrf.mxu1 }
 0x70b   :  { %3861 = vrcp.f32 %v1186_v57 }
 0x70c   :  { %v1054_v60 = vpop.f32.mrf.mxu1 }
 0x70d   :  { %v1189_v63 = vpop.xlane.xlu0 %1188 }
 0x70e   :  { %v986_v61 = vpop.permute.xlu1 %985  ;;  %v3524_v62 = vpop.f32.mrf.mxu1  ;;  %3863 = vrcp.f32 %v1189_v63 }
 0x70f   :  { %v1055_v10 = vadd.f32 %v1054_v60, %v986_v61 }
 0x710   :  { %v1059_v38 = vpop.f32.mrf.mxu1 }
 0x711   :  { %v1474_v54 = vpop.permute.xlu0 %1473  ;;  %v1060_v7 = vadd.f32 %v1059_v38, %v986_v61 }
 0x712   :  { %v3527_v43 = vpop.f32.mrf.mxu1  ;;  %v1472_v0 = vpop.permute.xlu1 %1471 }
 0x714   :  { %v1064_v2 = vpop.f32.mrf.mxu1 }
 0x715   :  { %v1065_v3 = vadd.f32 %v1064_v2, %v986_v61  ;;  %v1468_v16 = vpop.permute.xlu0 %1467 }
 0x716   :  { %v3530_v5 = vpop.f32.mrf.mxu1  ;;  %v1470_v15 = vpop.permute.xlu1 %1469 }
 0x717   :  { %v3860_v6 = vpop.eup %3859  ;;  %3543 = vmatpush3.msk.msra.mxu1 %vm785_vm8, %v1065_v3 }
 0x718   :  { %3544 = vmatprep.subr.mxu1 %v3942_v1  ;;  %v1191_v11 = vmul.f32 %v3860_v6, %v3854_v35  ;;  %v3862_v21 = vpop.eup %3861 }
 0x719   :  { %3545 = vmatpush3.msra.mxu1 %v1060_v7  ;;  %v1193_v22 = vmul.f32 %v3862_v21, %v4479_v36  ;;  %v4528_v27 = vpop.permute.xlu0 %1479 }
 0x71a   :  { %3546 = vmatprep.subr.mxu1 %v3942_v1  ;;  %v350_v26 = vpop.permute.xlu1 %349 }
 0x71b   :  { %3547 = vmatpush3.msra.mxu1 %v1055_v10  ;;  %v3864_v14 = vpop.eup %3863 }
 0x71c   :  { %3549 = vmatmul.mubr.msk.f32.vlgmr.msra.gmra.mxu1 %vm741_vm11, %v1191_v11  ;;  %3568 = vmatprep.subr.mxu1 %v3942_v1  ;;  %v1195_v28 = vmul.f32 %v3864_v14, %v4484_v39 }
 0x71d   :  { %3551 = vmatprep.mubr.msk.f32.mxu1 %vm3944_vm6, %v3942_v1  ;;  %3569 = vmatpush3.msra.mxu1 %v869_v17  ;;  %v1567_v36 = vpop.permute.xlu0 %1566 }
 0x71e   :  { %3596 = vmatprep.subr.mxu1 %v3942_v1  ;;  %v1569_v35 = vpop.permute.xlu1 %1568 }
 0x720   :  { %3552 = vmatmul.mubr.msk.f32.gmra.mxu1 %vm741_vm11, %v1193_v22 }
 0x721   :  { %3554 = vmatprep.mubr.msk.f32.mxu1 %vm3944_vm6, %v3942_v1  ;;  %v1563_v9 = vpop.permute.xlu0 %1562 }
 0x722   :  { %v1565_v37 = vpop.permute.xlu1 %1564 }
 0x724   :  { %3555 = vmatmul.mubr.msk.f32.gmra.mxu1 %vm741_vm11, %v1195_v28 }
 0x725   :  { %3570 = vmatprep.mubr.msk.f32.mxu1 %vm3944_vm6, %v3942_v1 }
 0x728   :  { %3571 = vmatmul.mubr.msk.f32.vlgmr.msra.gmra.mxu1 %vm645_vm7, %v855_v51 }
 0x729   :  { %3573 = vmatprep.mubr.msk.f32.mxu1 %vm3944_vm6, %v3942_v1  ;;  %3597 = vmatpush3.msra.mxu1 %v1569_v35 }
 0x72a   :  { %3598 = vmatprep.subr.mxu1 %v3942_v1 }
 0x72b   :  { %3599 = vmatpush3.msra.mxu1 %v1567_v36 }
 0x72c   :  { %3574 = vmatmul.mubr.msk.f32.gmra.mxu1 %vm645_vm7, %v860_v45  ;;  %3600 = vmatprep.subr.mxu1 %v3942_v1  ;;  %v455_v45 = vadd.f32 %v4379_v55, %v350_v26 }
 0x72d   :  { %3576 = vmatprep.mubr.msk.f32.mxu1 %vm3944_vm6, %v3942_v1  ;;  %3601 = vmatpush3.msra.mxu1 %v1565_v37 }
 0x72e   :  { %3602 = vmatprep.subr.mxu1 %v3942_v1 }
 0x72f   :  { %3603 = vmatpush3.msra.mxu1 %v1563_v9 }
 0x730   :  { %3577 = vmatmul.mubr.msk.f32.gmra.mxu1 %vm645_vm7, %v865_v47  ;;  %3624 = vmatprep.subr.mxu1 %v3942_v1 }
 0x731   :  { %3604 = vmatprep.mubr.msk.f32.mxu1 %vm3944_vm6, %v3942_v1 }
 0x734   :  { %3605 = vmatmul.mubr.msk.f32.vlgmr.msra.gmra.mxu1 %vm192_vm2, %v4276_v25 }
 0x735   :  { %3607 = vmatprep.mubr.msk.f32.mxu1 %vm3944_vm6, %v3942_v1 }
 0x738   :  { %3608 = vmatmul.mubr.msk.f32.gmra.mxu1 %vm192_vm2, %v4274_v24 }
 0x739   :  { %3610 = vmatprep.mubr.msk.f32.mxu1 %vm3944_vm6, %v3942_v1 }
 0x73c   :  { %3611 = vmatmul.mubr.msk.f32.gmra.mxu1 %vm192_vm2, %v4265_v19 }
 0x73d   :  { %3630 = vmatprep.mubr.msk.f32.mxu1 %vm3944_vm6, %v3942_v1 }
 0x7dc   :  { %v1274_v39 = vpop.f32.mrf.mxu1 }
 0x7dd   :  { %3560 = vmatmul.mubr.msk.f32.vlgmr.msra.gmra.mxu0 %vm645_vm7, %v1274_v39 }
 0x7de   :  { %v3550_v40 = vpop.f32.mrf.mxu1  ;;  %3562 = vmatprep.mubr.msk.f32.mxu0 %vm3944_vm6, %v3942_v1  ;;  %3580 = vmatpush3.msra.mxu0 %v1474_v54 }
 0x7df   :  { %3581 = vmatprep.subr.mxu0 %v3942_v1 }
 0x7e0   :  { %v1279_v41 = vpop.f32.mrf.mxu1  ;;  %3582 = vmatpush3.msra.mxu0 %v1472_v0 }
 0x7e1   :  { %3563 = vmatmul.mubr.msk.f32.gmra.mxu0 %vm645_vm7, %v1279_v41  ;;  %3583 = vmatprep.subr.mxu0 %v3942_v1 }
 0x7e2   :  { %v3553_v42 = vpop.f32.mrf.mxu1  ;;  %3565 = vmatprep.mubr.msk.f32.mxu0 %vm3944_vm6, %v3942_v1  ;;  %3584 = vmatpush3.msra.mxu0 %v1470_v15 }
 0x7e3   :  { %3585 = vmatprep.subr.mxu0 %v3942_v1 }
 0x7e4   :  { %v1284_v51 = vpop.f32.mrf.mxu1  ;;  %3586 = vmatpush3.msra.mxu0 %v1468_v16 }
 0x7e5   :  { %3566 = vmatmul.mubr.msk.f32.gmra.mxu0 %vm645_vm7, %v1284_v51  ;;  %3613 = vmatprep.subr.mxu0 %v3942_v1 }
 0x7e6   :  { %v3556_v44 = vpop.f32.mrf.mxu1  ;;  %3587 = vmatprep.mubr.msk.f32.mxu0 %vm3944_vm6, %v3942_v1 }
 0x7e8   :  { %v4575_v46 = vpop.f32.mrf.mxu1 }
 0x7e9   :  { %3588 = vmatmul.mubr.msk.f32.vlgmr.msra.gmra.mxu0 %vm192_vm2, %v4276_v25 }
 0x7ea   :  { %3614 = vmatpush3.msra.mxu0 %v455_v45  ;;  %v3572_v47 = vpop.f32.mrf.mxu1  ;;  %3590 = vmatprep.mubr.msk.f32.mxu0 %vm3944_vm6, %v3942_v1 }
 0x7eb   :  { %3639 = vmatprep.subr.mxu0 %v3942_v1 }
 0x7ec   :  { %v4582_v52 = vpop.f32.mrf.mxu1 }
 0x7ed   :  { %3591 = vmatmul.mubr.msk.f32.gmra.mxu0 %vm192_vm2, %v4274_v24 }
 0x7ee   :  { %v3575_v57 = vpop.f32.mrf.mxu1  ;;  %3593 = vmatprep.mubr.msk.f32.mxu0 %vm3944_vm6, %v3942_v1 }
 0x7f0   :  { %v4588_v55 = vpop.f32.mrf.mxu1 }
 0x7f1   :  { %3594 = vmatmul.mubr.msk.f32.gmra.mxu0 %vm192_vm2, %v4265_v19 }
 0x7f2   :  { %v3578_v58 = vpop.f32.mrf.mxu1  ;;  %3615 = vmatprep.mubr.msk.f32.mxu0 %vm3944_vm6, %v3942_v1 }
 0x7f4   :  { %v4594_v60 = vpop.f32.mrf.mxu1 }
 0x7f6   :  { %v3606_v61 = vpop.f32.mrf.mxu1 }
 0x7f8   :  { %v4596_v62 = vpop.f32.mrf.mxu1 }
 0x7fa   :  { %v3609_v63 = vpop.f32.mrf.mxu1 }
 0x7fc   :  { %v4598_v38 = vpop.f32.mrf.mxu1 }
 0x7fe   :  { %v3612_v43 = vpop.f32.mrf.mxu1 }
 0x89d   :  { %v4600_v54 = vpop.f32.mrf.mxu0 }
 0x89f   :  { %v3561_v0 = vpop.f32.mrf.mxu0 }
 0x8a1   :  { %v4602_v2 = vpop.f32.mrf.mxu0 }
 0x8a3   :  { %v3564_v3 = vpop.f32.mrf.mxu0 }
 0x8a5   :  { %v4604_v5 = vpop.f32.mrf.mxu0 }
 0x8a7   :  { %v3567_v6 = vpop.f32.mrf.mxu0 }
 0x8a9   :  { %v1548_v7 = vpop.f32.mrf.mxu0 }
 0x8aa   :  { %v1549_v10 = vadd.f32 %v1548_v7, %v4528_v27 }
 0x8ab   :  { %v3589_v11 = vpop.f32.mrf.mxu0 }
 0x8ac   :  { %3616 = vmatmul.mubr.msk.f32.vlgmr.msra.gmra.mxu0 %vm645_vm7, %v1549_v10 }
 0x8ad   :  { %v1553_v15 = vpop.f32.mrf.mxu0  ;;  %3618 = vmatprep.mubr.msk.f32.mxu0 %vm3944_vm6, %v3942_v1 }
 0x8ae   :  { %v1554_v16 = vadd.f32 %v1553_v15, %v4528_v27  ;;  %v336_v15 = vld [vmem:[%s4974_s7 + $0x18] sm:$0xff] }
 0x8af   :  { %v3592_v17 = vpop.f32.mrf.mxu0 }
 0x8b0   :  { %3619 = vmatmul.mubr.msk.f32.gmra.mxu0 %vm645_vm7, %v1554_v16 }
 0x8b1   :  { %v1558_v21 = vpop.f32.mrf.mxu0  ;;  %3621 = vmatprep.mubr.msk.f32.mxu0 %vm3944_vm6, %v3942_v1 }
 0x8b2   :  { %v1559_v22 = vadd.f32 %v1558_v21, %v4528_v27 }
 0x8b3   :  { %v3595_v14 = vpop.f32.mrf.mxu0 }
 0x8b4   :  { %3622 = vmatmul.mubr.msk.f32.gmra.mxu0 %vm645_vm7, %v1559_v22 }
 0x8b5   :  { %3641 = vmatprep.mubr.msk.f32.mxu0 %vm3944_vm6, %v3942_v1 }
 0x96c   :  { %v1732_v26 = vpop.f32.mrf.mxu0 }
 0x96d   :  { %v1746_v28 = vmul.f32 0.35355338, %v1732_v26 }
 0x96e   :  { %v3617_v35 = vpop.f32.mrf.mxu0 }
 0x96f   :  { %v1749_v36 = vadd.f32 %v1746_v28, %v4424_v59 }
 0x970   :  { %v1737_v37 = vpop.f32.mrf.mxu0 }
 0x971   :  { %v1747_v9 = vmul.f32 0.35355338, %v1737_v37  ;;  %v1752_v39 = vsel %vm741_vm11, %v1749_v36, -inf }
 0x972   :  { %1753 = vmax.xlane.f32.xlu1 %v1752_v39  ;;  %v3620_v40 = vpop.f32.mrf.mxu0 }
 0x973   :  { %v1750_v41 = vadd.f32 %v1747_v9, %v4428_v4  ;;  %v1877_v40 = vld [vmem:[%s4977_s10 + $0x10] sm:$0xff] }
 0x974   :  { %v1742_v27 = vpop.f32.mrf.mxu0  ;;  %3640 = vmatpush3.msra.mxu0 %v1877_v40 }
 0x975   :  { %v1748_v42 = vmul.f32 0.35355338, %v1742_v27  ;;  %v1755_v51 = vsel %vm741_vm11, %v1750_v41, -inf  ;;  %3667 = vmatprep.subr.mxu0 %v3942_v1 }
 0x976   :  { %1756 = vmax.xlane.f32.xlu0 %v1755_v51  ;;  %v3623_v44 = vpop.f32.mrf.mxu0 }
 0x977   :  { %v1751_v45 = vadd.f32 %v1748_v42, %v4432_v13 }
 0x979   :  { %v1758_v47 = vsel %vm748_vm13, %v1751_v45, -inf }
 0x97a   :  { %1759 = vmax.xlane.f32.xlu0 %v1758_v47 }
 0x9fb   :  { %v1754_v57 = vpop.xlane.xlu1 %1753 }
 0x9fc   :  { %v1761_v58 = vsub.f32 %v1749_v36, %v1754_v57 }
 0x9fe   :  { %v1764_v61 = vmul.f32 1.442695, %v1761_v58 }
 0x9ff   :  { %v1757_v63 = vpop.xlane.xlu0 %1756 }
 0xa00   :  { %3865 = vpow2.f32 %v1764_v61  ;;  %v1762_v43 = vsub.f32 %v1750_v41, %v1757_v63 }
 0xa02   :  { %v1766_v0 = vmul.f32 1.442695, %v1762_v43 }
 0xa03   :  { %v1760_v11 = vpop.xlane.xlu0 %1759 }
 0xa04   :  { %3867 = vpow2.f32 %v1766_v0  ;;  %v1763_v16 = vsub.f32 %v1751_v45, %v1760_v11 }
 0xa06   :  { %v1768_v17 = vmul.f32 1.442695, %v1763_v16 }
 0xa08   :  { %3869 = vpow2.f32 %v1768_v17 }
 0xa0d   :  { %v3866_v3 = vpop.eup %3865 }
 0xa0e   :  { %v1770_v6 = vsel %vm741_vm11, %v3866_v3, 0.0 }
 0xa0f   :  { %1771 = vadd.xlane.f32.xlu1 %v1770_v6 }
 0xa11   :  { %v3868_v7 = vpop.eup %3867 }
 0xa12   :  { %v1773_v10 = vsel %vm741_vm11, %v3868_v7, 0.0 }
 0xa13   :  { %1774 = vadd.xlane.f32.xlu0 %v1773_v10 }
 0xa20   :  { %1976 = vrot.lane.b32.xlu1 %v4213_v48, %s3948_s25  ;;  %v3870_v48 = vpop.eup %3869 }
 0xa24   :  { %1974 = vrot.lane.b32.xlu1 %v4220_v49, %s3948_s25  ;;  %v1776_v49 = vsel %vm748_vm13, %v3870_v48, 0.0 }
 0xa29   :  { %1574 = vrot.lane.b32.xlu0 %v4403_v8, %s3947_s22 }
 0xa2d   :  { %1972 = vrot.lane.b32.xlu0 %v4227_v50, %s3948_s25  ;;  %v3917_v50 = vld [vmem:[%s4971_s4] sm:$0xff] }
 0xa31   :  { %354 = vperm.xlu0 %3827, %v336_v15  }
 0xa35   :  { %2071 = vrot.lane.b32.xlu0 %v4322_v31, %s3948_s25 }
 0xa39   :  { %2067 = vrot.lane.b32.xlu0 %v4340_v33, %s3948_s25 }
 0xa48   :  { %1777 = vadd.xlane.f32.xlu1 %v1776_v49 }
 0xa59   :  { %1970 = vrot.lane.b32.xlu1 %v3917_v50, %s3948_s25 }
 0xa5d   :  { %1982 = vrot.lane.b32.xlu1 %v4253_v56, %s3948_s25 }
 0xa61   :  { %2069 = vrot.lane.b32.xlu1 %v4331_v32, %s3948_s25 }
 0xa65   :  { %2065 = vrot.lane.b32.xlu1 %v4349_v34, %s3948_s25 }
 0xa98   :  { %v1772_v31 = vpop.xlane.xlu1 %1771 }
 0xa99   :  { %3871 = vrcp.f32 %v1772_v31  ;;  %v1464_v31 = vadd.f32 %v4588_v55, %v4604_v5 }
 0xa9c   :  { %v1775_v33 = vpop.xlane.xlu0 %1774  ;;  %v1977_v56 = vpop.permute.xlu1 %1976 }
 0xa9d   :  { %3873 = vrcp.f32 %v1775_v33 }
 0xaa0   :  { %v1575_v8 = vpop.permute.xlu0 %1574 }
 0xaa1   :  { %v1654_v21 = vadd.f32 %v4598_v38, %v1575_v8  ;;  %v1649_v22 = vadd.f32 %v4596_v62, %v1575_v8  ;;  %v1644_v14 = vadd.f32 %v4594_v60, %v1575_v8  ;;  %v1975_v62 = vpop.permute.xlu1 %1974 }
 0xaa3   :  { %3625 = vmatpush3.msk.msra.mxu1 %vm785_vm8, %v1654_v21 }
 0xaa4   :  { %3626 = vmatprep.subr.mxu1 %v3942_v1  ;;  %v1973_v60 = vpop.permute.xlu0 %1972 }
 0xaa5   :  { %3627 = vmatpush3.msra.mxu1 %v1649_v22 }
 0xaa6   :  { %v3872_v32 = vpop.eup %3871  ;;  %3628 = vmatprep.subr.mxu1 %v3942_v1 }
 0xaa7   :  { %v1780_v34 = vmul.f32 %v3872_v32, %v3866_v3  ;;  %3629 = vmatpush3.msra.mxu1 %v1644_v14 }
 0xaa8   :  { %3650 = vmatprep.subr.mxu1 %v3942_v1 }
 0xaa9   :  { %3631 = vmatmul.mubr.msk.f32.vlgmr.msra.gmra.mxu1 %vm741_vm11, %v1780_v34 }
 0xaaa   :  { %v3874_v38 = vpop.eup %3873  ;;  %3651 = vmatpush3.msra.mxu1 %v1977_v56  ;;  %3633 = vmatprep.mubr.msk.f32.mxu1 %vm3944_vm6, %v3942_v1 }
 0xaab   :  { %3652 = vmatprep.subr.mxu1 %v3942_v1  ;;  %v1782_v26 = vmul.f32 %v3874_v38, %v3868_v7 }
 0xaac   :  { %3653 = vmatpush3.msra.mxu1 %v1975_v62  ;;  %v355_v9 = vpop.permute.xlu0 %354 }
 0xaad   :  { %3634 = vmatmul.mubr.msk.f32.gmra.mxu1 %vm741_vm11, %v1782_v26  ;;  %3654 = vmatprep.subr.mxu1 %v3942_v1  ;;  %v460_v39 = vadd.f32 %v4373_v53, %v355_v9 }
 0xaae   :  { %3636 = vmatprep.mubr.msk.f32.mxu1 %vm3944_vm6, %v3942_v1  ;;  %3655 = vmatpush3.msra.mxu1 %v1973_v60 }
 0xaaf   :  { %3656 = vmatprep.subr.mxu1 %v3942_v1 }
 0xab0   :  { %v2072_v41 = vpop.permute.xlu0 %2071 }
 0xab4   :  { %v2068_v44 = vpop.permute.xlu0 %2067 }
 0xad1   :  { %v1778_v28 = vpop.xlane.xlu1 %1777 }
 0xad2   :  { %3875 = vrcp.f32 %v1778_v28 }
 0xad5   :  { %v1971_v35 = vpop.permute.xlu1 %1970 }
 0xad6   :  { %3657 = vmatpush3.msra.mxu1 %v1971_v35 }
 0xad7   :  { %3684 = vmatprep.subr.mxu1 %v3942_v1 }
 0xad9   :  { %v1983_v53 = vpop.permute.xlu1 %1982 }
 0xadd   :  { %v2070_v27 = vpop.permute.xlu1 %2069 }
 0xadf   :  { %v3876_v36 = vpop.eup %3875 }
 0xae0   :  { %v1784_v37 = vmul.f32 %v3876_v36, %v3870_v48  ;;  %v1459_v48 = vadd.f32 %v4582_v52, %v4602_v2 }
 0xae1   :  { %v2066_v47 = vpop.permute.xlu1 %2065 }
 0xae2   :  { %3637 = vmatmul.mubr.msk.f32.gmra.mxu1 %vm741_vm11, %v1784_v37 }
 0xae3   :  { %3658 = vmatprep.mubr.msk.f32.mxu1 %vm3944_vm6, %v3942_v1 }
 0xae6   :  { %3659 = vmatmul.mubr.msk.f32.vlgmr.msra.gmra.mxu1 %vm192_vm2, %v4276_v25 }
 0xae7   :  { %3685 = vmatpush3.msra.mxu1 %v460_v39  ;;  %3661 = vmatprep.mubr.msk.f32.mxu1 %vm3944_vm6, %v3942_v1 }
 0xae8   :  { %3710 = vmatprep.subr.mxu1 %v3942_v1 }
 0xaea   :  { %3662 = vmatmul.mubr.msk.f32.gmra.mxu1 %vm192_vm2, %v4274_v24 }
 0xaeb   :  { %3664 = vmatprep.mubr.msk.f32.mxu1 %vm3944_vm6, %v3942_v1 }
 0xaee   :  { %3665 = vmatmul.mubr.msk.f32.gmra.mxu1 %vm192_vm2, %v4265_v19 }
 0xaef   :  { %3686 = vmatprep.mubr.msk.f32.mxu1 %vm3944_vm6, %v3942_v1 }
 0xb69   :  { %v1863_v42 = vpop.f32.mrf.mxu1 }
 0xb6a   :  { %3642 = vmatmul.mubr.msk.f32.vlgmr.msra.gmra.mxu0 %vm645_vm7, %v1863_v42 }
 0xb6b   :  { %v3632_v51 = vpop.f32.mrf.mxu1  ;;  %3644 = vmatprep.mubr.msk.f32.mxu0 %vm3944_vm6, %v3942_v1  ;;  %3668 = vmatpush3.msra.mxu0 %v2072_v41 }
 0xb6c   :  { %3669 = vmatprep.subr.mxu0 %v3942_v1 }
 0xb6d   :  { %v1868_v45 = vpop.f32.mrf.mxu1  ;;  %3670 = vmatpush3.msra.mxu0 %v2070_v27 }
 0xb6e   :  { %3645 = vmatmul.mubr.msk.f32.gmra.mxu0 %vm645_vm7, %v1868_v45  ;;  %3671 = vmatprep.subr.mxu0 %v3942_v1 }
 0xb6f   :  { %v3635_v57 = vpop.f32.mrf.mxu1  ;;  %3647 = vmatprep.mubr.msk.f32.mxu0 %vm3944_vm6, %v3942_v1  ;;  %3672 = vmatpush3.msra.mxu0 %v2068_v44 }
 0xb70   :  { %3673 = vmatprep.subr.mxu0 %v3942_v1 }
 0xb71   :  { %3674 = vmatpush3.msra.mxu0 %v2066_v47 }
 0xb72   :  { %3695 = vmatprep.subr.mxu0 %v3942_v1 }
 0xba2   :  { %v1873_v58 = vpop.f32.mrf.mxu1 }
 0xba3   :  { %3648 = vmatmul.mubr.msk.f32.gmra.mxu0 %vm645_vm7, %v1873_v58 }
 0xba4   :  { %v3638_v61 = vpop.f32.mrf.mxu1  ;;  %3675 = vmatprep.mubr.msk.f32.mxu0 %vm3944_vm6, %v3942_v1 }
 0xba6   :  { %v2051_v63 = vpop.f32.mrf.mxu1 }
 0xba7   :  { %v2052_v43 = vadd.f32 %v2051_v63, %v1983_v53  ;;  %3676 = vmatmul.mubr.msk.f32.vlgmr.msra.gmra.mxu0 %vm192_vm2, %v4276_v25  ;;  %v3918_v63 = vld [vmem:[%s4976_s9] ss:$0 sm:$0xff] }
 0xba8   :  { %v3660_v0 = vpop.f32.mrf.mxu1  ;;  %3678 = vmatprep.mubr.msk.f32.mxu0 %vm3944_vm6, %v3942_v1 }
 0xba9   :  { %3687 = vmatmul.mubr.msk.f32.vlgmr.msra.gmra.mxu1 %vm645_vm7, %v2052_v43  ;;  %v2380_v43 = vld [vmem:[%s4977_s10 + $0x18] sm:$0xff] }
 0xbaa   :  { %v2056_v3 = vpop.f32.mrf.mxu1  ;;  %3689 = vmatprep.mubr.msk.f32.mxu1 %vm3944_vm6, %v3942_v1  ;;  %3711 = vmatpush3.msra.mxu1 %v2380_v43 }
 0xbab   :  { %v2057_v6 = vadd.f32 %v2056_v3, %v1983_v53  ;;  %3679 = vmatmul.mubr.msk.f32.gmra.mxu0 %vm192_vm2, %v4274_v24  ;;  %v1454_v24 = vadd.f32 %v4575_v46, %v4600_v54  ;;  %3738 = vmatprep.subr.mxu1 %v3942_v1 }
 0xbac   :  { %v3663_v7 = vpop.f32.mrf.mxu1  ;;  %3681 = vmatprep.mubr.msk.f32.mxu0 %vm3944_vm6, %v3942_v1 }
 0xbad   :  { %3690 = vmatmul.mubr.msk.f32.gmra.mxu1 %vm645_vm7, %v2057_v6 }
 0xbae   :  { %v2061_v25 = vpop.f32.mrf.mxu1  ;;  %3692 = vmatprep.mubr.msk.f32.mxu1 %vm3944_vm6, %v3942_v1 }
 0xbaf   :  { %v2062_v10 = vadd.f32 %v2061_v25, %v1983_v53  ;;  %3682 = vmatmul.mubr.msk.f32.gmra.mxu0 %vm192_vm2, %v4265_v19 }
 0xbb0   :  { %v3666_v11 = vpop.f32.mrf.mxu1  ;;  %3701 = vmatprep.mubr.msk.f32.mxu0 %vm3944_vm6, %v3942_v1 }
 0xbb1   :  { %3693 = vmatmul.mubr.msk.f32.gmra.mxu1 %vm645_vm7, %v2062_v10 }
 0xbb2   :  { %3712 = vmatprep.mubr.msk.f32.mxu1 %vm3944_vm6, %v3942_v1 }
 0xc2a   :  { %v1953_v15 = vpop.f32.mrf.mxu0 }
 0xc2b   :  { %v4726_v16 = vadd.f32 %v1953_v15, %v1454_v24 }
 0xc2c   :  { %v3643_v17 = vpop.f32.mrf.mxu0 }
 0xc2e   :  { %v1958_v19 = vpop.f32.mrf.mxu0 }
 0xc2f   :  { %v4730_v49 = vadd.f32 %v1958_v19, %v1459_v48 }
 0xc30   :  { %v3646_v50 = vpop.f32.mrf.mxu0 }
 0xc63   :  { %v1963_v33 = vpop.f32.mrf.mxu0 }
 0xc64   :  { %v4734_v8 = vadd.f32 %v1963_v33, %v1464_v31 }
 0xc65   :  { %v3649_v21 = vpop.f32.mrf.mxu0 }
 0xc67   :  { %v2146_v22 = vpop.f32.mrf.mxu0 }
 0xc69   :  { %v3677_v46 = vpop.f32.mrf.mxu0  ;;  %v2235_v54 = vpop.f32.mrf.mxu1 }
 0xc6a   :  { %v2249_v56 = vmul.f32 0.35355338, %v2235_v54 }
 0xc6b   :  { %v2151_v14 = vpop.f32.mrf.mxu0  ;;  %v3688_v32 = vpop.f32.mrf.mxu1 }
 0xc6c   :  { %v2252_v34 = vadd.f32 %v2249_v56, %v4424_v59  ;;  %v3248_v32 = vld [vmem:[%s4978_s11] ss:$0 sm:$0xff] }
 0xc6d   :  { %v3680_v52 = vpop.f32.mrf.mxu0  ;;  %v2240_v2 = vpop.f32.mrf.mxu1 }
 0xc6e   :  { %v2250_v38 = vmul.f32 0.35355338, %v2240_v2  ;;  %v2255_v62 = vsel %vm741_vm11, %v2252_v34, -inf }
 0xc6f   :  { %v2156_v26 = vpop.f32.mrf.mxu0  ;;  %2256 = vmax.xlane.f32.xlu0 %v2255_v62  ;;  %v3691_v55 = vpop.f32.mrf.mxu1 }
 0xc70   :  { %v2253_v5 = vadd.f32 %v2250_v38, %v4428_v4 }
 0xc71   :  { %v3683_v60 = vpop.f32.mrf.mxu0  ;;  %v2245_v28 = vpop.f32.mrf.mxu1 }
 0xc72   :  { %v2251_v35 = vmul.f32 0.35355338, %v2245_v28  ;;  %v2258_v36 = vsel %vm741_vm11, %v2253_v5, -inf }
 0xc73   :  { %2259 = vmax.xlane.f32.xlu1 %v2258_v36  ;;  %v3694_v37 = vpop.f32.mrf.mxu1 }
 0xc74   :  { %v2254_v9 = vadd.f32 %v2251_v35, %v4432_v13 }
 0xc76   :  { %v2261_v59 = vsel %vm748_vm13, %v2254_v9, -inf }
 0xc77   :  { %2262 = vmax.xlane.f32.xlu0 %v2261_v59 }
 0xcf8   :  { %v2257_v39 = vpop.xlane.xlu0 %2256 }
 0xcf9   :  { %v2264_v40 = vsub.f32 %v2252_v34, %v2257_v39 }
 0xcfb   :  { %v2267_v53 = vmul.f32 1.442695, %v2264_v40 }
 0xcfc   :  { %v2260_v41 = vpop.xlane.xlu1 %2259 }
 0xcfd   :  { %3877 = vpow2.f32 %v2267_v53  ;;  %v2265_v27 = vsub.f32 %v2253_v5, %v2260_v41 }
 0xcff   :  { %v2269_v42 = vmul.f32 1.442695, %v2265_v27 }
 0xd00   :  { %v2263_v4 = vpop.xlane.xlu0 %2262 }
 0xd01   :  { %3879 = vpow2.f32 %v2269_v42  ;;  %v2266_v51 = vsub.f32 %v2254_v9, %v2263_v4 }
 0xd03   :  { %v2271_v44 = vmul.f32 1.442695, %v2266_v51 }
 0xd05   :  { %3881 = vpow2.f32 %v2271_v44 }
 0xd0a   :  { %v3878_v45 = vpop.eup %3877 }
 0xd0b   :  { %v2273_v47 = vsel %vm741_vm11, %v3878_v45, 0.0 }
 0xd0c   :  { %2274 = vadd.xlane.f32.xlu0 %v2273_v47  ;;  %v2542_v47 = vld [vmem:[%s4979_s12 + $0x18] sm:$0xff] }
 0xd0e   :  { %v3880_v13 = vpop.eup %3879 }
 0xd0f   :  { %v2276_v57 = vsel %vm741_vm11, %v3880_v13, 0.0 }
 0xd10   :  { %2277 = vadd.xlane.f32.xlu1 %v2276_v57  ;;  %v2540_v57 = vld [vmem:[%s4979_s12 + $0x8] sm:$0xff] }
 0xd12   :  { %v3882_v58 = vpop.eup %3881 }
 0xd13   :  { %v2279_v61 = vsel %vm748_vm13, %v3882_v58, 0.0 }
 0xd14   :  { %2280 = vadd.xlane.f32.xlu0 %v2279_v61 }
 0xd21   :  { %2077 = vrot.lane.b32.xlu1 %v3918_v63, %s3948_s25 }
 0xd95   :  { %v2275_v0 = vpop.xlane.xlu0 %2274 }
 0xd96   :  { %3883 = vrcp.f32 %v2275_v0 }
 0xd99   :  { %v2278_v3 = vpop.xlane.xlu1 %2277 }
 0xd9a   :  { %3885 = vrcp.f32 %v2278_v3 }
 0xd9d   :  { %v2078_v6 = vpop.permute.xlu1 %2077  ;;  %v2281_v7 = vpop.xlane.xlu0 %2280 }
 0xd9e   :  { %v2157_v25 = vadd.f32 %v2156_v26, %v2078_v6  ;;  %3887 = vrcp.f32 %v2281_v7  ;;  %v2152_v10 = vadd.f32 %v2151_v14, %v2078_v6  ;;  %v2147_v11 = vadd.f32 %v2146_v22, %v2078_v6 }
 0xda0   :  { %3696 = vmatpush3.msk.msra.mxu0 %vm785_vm8, %v2157_v25 }
 0xda1   :  { %3697 = vmatprep.subr.mxu0 %v3942_v1 }
 0xda2   :  { %3698 = vmatpush3.msra.mxu0 %v2152_v10 }
 0xda3   :  { %v3884_v24 = vpop.eup %3883  ;;  %3699 = vmatprep.subr.mxu0 %v3942_v1 }
 0xda4   :  { %v2283_v15 = vmul.f32 %v3884_v24, %v3878_v45  ;;  %3700 = vmatpush3.msra.mxu0 %v2147_v11  ;;  %v2527_v11 = vsub.s32 4, %v4169_v12  ;;  %v2534_v24 = vsub.s32 5, %v4169_v12 }
 0xda5   :  { %3721 = vmatprep.subr.mxu0 %v3942_v1 }
 0xda6   :  { %3702 = vmatmul.mubr.msk.f32.vlgmr.msra.gmra.mxu0 %vm741_vm11, %v2283_v15  ;;  %v4823_v15 = vld [vmem:[%s4970_s3] sm:$0xff] }
 0xda7   :  { %v3886_v17 = vpop.eup %3885  ;;  %3704 = vmatprep.mubr.msk.f32.mxu0 %vm3944_vm6, %v3942_v1  ;;  %3722 = vmatpush3.msra.mxu0 %v2542_v47 }
 0xda8   :  { %v2285_v48 = vmul.f32 %v3886_v17, %v3880_v13  ;;  %3723 = vmatprep.subr.mxu0 %v3942_v1  ;;  %v2541_v13 = vld [vmem:[%s4979_s12 + $0x10] sm:$0xff]  ;;  %v2528_v17 = vrot.slane %v4823_v15, %v2527_v11 }
 0xda9   :  { %3724 = vmatpush3.msra.mxu0 %v2541_v13 }
 0xdaa   :  { %3705 = vmatmul.mubr.msk.f32.gmra.mxu0 %vm741_vm11, %v2285_v48  ;;  %3725 = vmatprep.subr.mxu0 %v3942_v1 }
 0xdab   :  { %v3888_v19 = vpop.eup %3887  ;;  %3707 = vmatprep.mubr.msk.f32.mxu0 %vm3944_vm6, %v3942_v1  ;;  %3726 = vmatpush3.msra.mxu0 %v2540_v57 }
 0xdac   :  { %v2287_v50 = vmul.f32 %v3888_v19, %v3882_v58  ;;  %v2539_v58 = vld [vmem:[%s4979_s12] sm:$0xff]  ;;  %3727 = vmatprep.subr.mxu0 %v3942_v1 }
 0xdad   :  { %3728 = vmatpush3.msra.mxu0 %v2539_v58 }
 0xdae   :  { %3708 = vmatmul.mubr.msk.f32.gmra.mxu0 %vm741_vm11, %v2287_v50  ;;  %3779 = vmatprep.subr.mxu0 %v3942_v1  ;;  %v2535_v50 = vrot.slane %v4823_v15, %v2534_v24 }
 0xdaf   :  { %3729 = vmatprep.mubr.msk.f32.mxu0 %vm3944_vm6, %v3942_v1 }
 0xe66   :  { %v2366_v31 = vpop.f32.mrf.mxu0 }
 0xe67   :  { %3713 = vmatmul.mubr.msk.f32.vlgmr.msra.gmra.mxu1 %vm645_vm7, %v2366_v31 }
 0xe68   :  { %v3703_v33 = vpop.f32.mrf.mxu0  ;;  %3715 = vmatprep.mubr.msk.f32.mxu1 %vm3944_vm6, %v3942_v1 }
 0xe6a   :  { %v2371_v21 = vpop.f32.mrf.mxu0 }
 0xe6b   :  { %3716 = vmatmul.mubr.msk.f32.gmra.mxu1 %vm645_vm7, %v2371_v21 }
 0xe6c   :  { %v3706_v22 = vpop.f32.mrf.mxu0  ;;  %3718 = vmatprep.mubr.msk.f32.mxu1 %vm3944_vm6, %v3942_v1 }
 0xe6e   :  { %v2376_v46 = vpop.f32.mrf.mxu0 }
 0xe6f   :  { %3719 = vmatmul.mubr.msk.f32.gmra.mxu1 %vm645_vm7, %v2376_v46  ;;  %vm3156_vm7 = vcmask 0  }
 0xe70   :  { %v3709_v54 = vpop.f32.mrf.mxu0  ;;  %3770 = vmatprep.mubr.msk.f32.mxu1 %vm3944_vm6, %v3942_v1 }
 0xf27   :  { %v2456_v56 = vpop.f32.mrf.mxu1 }
 0xf28   :  { %v2470_v14 = vadd.f32 %v2456_v56, %v4726_v16 }
 0xf29   :  { %v3714_v34 = vpop.f32.mrf.mxu1 }
 0xf2a   :  { %v2473_v52 = vadd.f32 %v2470_v14, %v4186_v30 }
 0xf2b   :  { %v2461_v2 = vpop.f32.mrf.mxu1 }
 0xf2c   :  { %v4780_v38 = vadd.f32 %v3248_v32, %v2473_v52  ;;  %v2471_v62 = vadd.f32 %v2461_v2, %v4730_v49  ;;  %v2675_v52 = vld [vmem:[%s4981_s14 + $0x78] sm:$0xff]  ;;  %v2674_v2 = vld [vmem:[%s4981_s14 + $0x70] sm:$0xff] }
 0xf2d   :  { %v3717_v26 = vpop.f32.mrf.mxu1  ;;  %3739 = vmatpush3.msra.mxu1 %v2675_v52 }
 0xf2e   :  { %v2474_v55 = vadd.f32 %v2471_v62, %v4184_v29  ;;  %v2486_v5 = vsel %vm192_vm2, %v4780_v38, 0.0  ;;  %3740 = vmatprep.subr.mxu1 %v3942_v1  ;;  %v2673_v62 = vld [vmem:[%s4981_s14 + $0x68] sm:$0xff]  ;;  %v2672_v26 = vld [vmem:[%s4981_s14 + $0x60] sm:$0xff] }
 0xf2f   :  { %2487 = vadd.xlane.f32.xlu0 %v2486_v5  ;;  %v2466_v16 = vpop.f32.mrf.mxu1  ;;  %3741 = vmatpush3.msra.mxu1 %v2674_v2  ;;  %v2670_v5 = vld [vmem:[%s4981_s14 + $0x50] sm:$0xff] }
 0xf30   :  { %v4786_v60 = vadd.f32 %v3248_v32, %v2474_v55  ;;  %v2472_v28 = vadd.f32 %v2466_v16, %v4734_v8  ;;  %3742 = vmatprep.subr.mxu1 %v3942_v1  ;;  %v2671_v55 = vld [vmem:[%s4981_s14 + $0x58] sm:$0xff]  ;;  %v2669_v16 = vld [vmem:[%s4981_s14 + $0x48] sm:$0xff] }
 0xf31   :  { %v3720_v35 = vpop.f32.mrf.mxu1  ;;  %3743 = vmatpush3.msra.mxu1 %v2673_v62 }
 0xf32   :  { %v2475_v30 = vadd.f32 %v2472_v28, %v4180_v23  ;;  %v2489_v36 = vsel %vm192_vm2, %v4786_v60, 0.0  ;;  %3744 = vmatprep.subr.mxu1 %v3942_v1  ;;  %v2668_v28 = vld [vmem:[%s4981_s14 + $0x40] sm:$0xff]  ;;  %v2667_v35 = vld [vmem:[%s4981_s14 + $0x38] sm:$0xff] }
 0xf33   :  { %2490 = vadd.xlane.f32.xlu0 %v2489_v36  ;;  %3745 = vmatpush3.msra.mxu1 %v2672_v26  ;;  %v2665_v36 = vld [vmem:[%s4981_s14 + $0x28] sm:$0xff] }
 0xf34   :  { %v4792_v49 = vadd.f32 %v3248_v32, %v2475_v30  ;;  %3746 = vmatprep.subr.mxu1 %v3942_v1  ;;  %v2666_v30 = vld [vmem:[%s4981_s14 + $0x30] sm:$0xff] }
 0xf35   :  { %3747 = vmatpush3.msra.mxu1 %v2671_v55 }
 0xf36   :  { %v2492_v29 = vsel %vm199_vm5, %v4792_v49, 0.0  ;;  %3748 = vmatprep.subr.mxu1 %v3942_v1 }
 0xf37   :  { %2493 = vadd.xlane.f32.xlu0 %v2492_v29  ;;  %3749 = vmatpush3.msra.mxu1 %v2670_v5  ;;  %v2664_v29 = vld [vmem:[%s4981_s14 + $0x20] sm:$0xff] }
 0xf38   :  { %3750 = vmatprep.subr.mxu1 %v3942_v1 }
 0xf39   :  { %3751 = vmatpush3.msra.mxu1 %v2669_v16 }
 0xf3a   :  { %3752 = vmatprep.subr.mxu1 %v3942_v1 }
 0xf3b   :  { %3753 = vmatpush3.msra.mxu1 %v2668_v28 }
 0xf3c   :  { %3754 = vmatprep.subr.mxu1 %v3942_v1 }
 0xf3d   :  { %3755 = vmatpush3.msra.mxu1 %v2667_v35 }
 0xf3e   :  { %3756 = vmatprep.subr.mxu1 %v3942_v1 }
 0xf3f   :  { %3757 = vmatpush3.msra.mxu1 %v2666_v30 }
 0xf40   :  { %3758 = vmatprep.subr.mxu1 %v3942_v1 }
 0xf41   :  { %3759 = vmatpush3.msra.mxu1 %v2665_v36 }
 0xf42   :  { %3760 = vmatprep.subr.mxu1 %v3942_v1 }
 0xf43   :  { %3761 = vmatpush3.msra.mxu1 %v2664_v29 }
 0xf44   :  { %3762 = vmatprep.subr.mxu1 %v3942_v1 }
 0xfb8   :  { %v2488_v37 = vpop.xlane.xlu0 %2487 }
 0xfb9   :  { %v2495_v9 = vmul.f32 0.03125, %v2488_v37  ;;  %v2663_v37 = vld [vmem:[%s4981_s14 + $0x18] sm:$0xff] }
 0xfba   :  { %3763 = vmatpush3.msra.mxu1 %v2663_v37 }
 0xfbb   :  { %v2498_v59 = vsub.f32 %v4780_v38, %v2495_v9  ;;  %3764 = vmatprep.subr.mxu1 %v3942_v1  ;;  %v2662_v9 = vld [vmem:[%s4981_s14 + $0x10] sm:$0xff] }
 0xfbc   :  { %v2491_v39 = vpop.xlane.xlu0 %2490  ;;  %3765 = vmatpush3.msra.mxu1 %v2662_v9 }
 0xfbd   :  { %v2496_v40 = vmul.f32 0.03125, %v2491_v39  ;;  %v2501_v8 = vmul.f32 %v2498_v59, %v2498_v59  ;;  %3766 = vmatprep.subr.mxu1 %v3942_v1  ;;  %v2660_v39 = vld [vmem:[%s4981_s14] sm:$0xff] }
 0xfbf   :  { %v2499_v53 = vsub.f32 %v4786_v60, %v2496_v40  ;;  %v2504_v23 = vsel %vm192_vm2, %v2501_v8, 0.0  ;;  %v3249_v40 = vld [vmem:[%s4980_s13] ss:$0 sm:$0xff] }
 0xfc0   :  { %2505 = vadd.xlane.f32.xlu0 %v2504_v23  ;;  %v2494_v41 = vpop.xlane.xlu0 %2493 }
 0xfc1   :  { %v2497_v27 = vmul.f32 0.03125, %v2494_v41  ;;  %v2502_v42 = vmul.f32 %v2499_v53, %v2499_v53 }
 0xfc3   :  { %v2500_v4 = vsub.f32 %v4792_v49, %v2497_v27  ;;  %v2507_v51 = vsel %vm192_vm2, %v2502_v42, 0.0 }
 0xfc4   :  { %2508 = vadd.xlane.f32.xlu1 %v2507_v51 }
 0xfc5   :  { %v2503_v44 = vmul.f32 %v2500_v4, %v2500_v4 }
 0xfc7   :  { %v2510_v45 = vsel %vm199_vm5, %v2503_v44, 0.0 }
 0xfc8   :  { %2511 = vadd.xlane.f32.xlu0 %v2510_v45 }
0x1049   :  { %v2506_v61 = vpop.xlane.xlu0 %2505 }
0x104a   :  { %v2513_v63 = vmul.f32 0.03125, %v2506_v61 }
0x104c   :  { %v2516_v43 = vadd.f32 1e-05, %v2513_v63 }
0x104d   :  { %v2509_v0 = vpop.xlane.xlu1 %2508 }
0x104e   :  { %3889 = vrsqrt.f32 %v2516_v43  ;;  %v2514_v3 = vmul.f32 0.03125, %v2509_v0 }
0x1050   :  { %v2517_v6 = vadd.f32 1e-05, %v2514_v3 }
0x1051   :  { %v2512_v7 = vpop.xlane.xlu0 %2511 }
0x1052   :  { %3891 = vrsqrt.f32 %v2517_v6  ;;  %v2515_v25 = vmul.f32 0.03125, %v2512_v7 }
0x1054   :  { %v2518_v10 = vadd.f32 1e-05, %v2515_v25 }
0x1056   :  { %3893 = vrsqrt.f32 %v2518_v10 }
0x105b   :  { %v3890_v48 = vpop.eup %3889 }
0x105c   :  { %v2522_v19 = vmul.f32 %v3890_v48, %v2498_v59  ;;  %v2661_v59 = vld [vmem:[%s4981_s14 + $0x8] sm:$0xff] }
0x105d   :  { %3767 = vmatpush3.msra.mxu1 %v2661_v59 }
0x105e   :  { %v2529_v31 = vmul.f32 %v2528_v17, %v2522_v19  ;;  %3768 = vmatprep.subr.mxu1 %v3942_v1 }
0x105f   :  { %v3892_v33 = vpop.eup %3891  ;;  %3769 = vmatpush3.msra.mxu1 %v2660_v39 }
0x1060   :  { %v2536_v21 = vadd.f32 %v2535_v50, %v2529_v31  ;;  %v2523_v22 = vmul.f32 %v3892_v33, %v2499_v53 }
0x1062   :  { %3730 = vmatmul.mubr.msk.f32.vlgmr.msra.gmra.mxu0 %vm192_vm2, %v2536_v21  ;;  %v2530_v46 = vmul.f32 %v2528_v17, %v2523_v22  ;;  %v3253_v21 = vld [vmem:[%s4982_s15] ss:$0 sm:$0xff] }
0x1063   :  { %v3894_v54 = vpop.eup %3893  ;;  %3732 = vmatprep.mubr.msk.f32.mxu0 %vm3944_vm6, %v3942_v1 }
0x1064   :  { %v2537_v56 = vadd.f32 %v2535_v50, %v2530_v46  ;;  %v2524_v14 = vmul.f32 %v3894_v54, %v2500_v4  ;;  %v2767_v46 = vmul.f32 5.0, %v4414_v18 }
0x1066   :  { %3733 = vmatmul.mubr.msk.f32.gmra.mxu0 %vm192_vm2, %v2537_v56  ;;  %v2531_v32 = vmul.f32 %v2528_v17, %v2524_v14  ;;  %vm2768_vm14 = vcmp.eq.f32.partialorder %v4416_v20, %v2767_v46 }
0x1067   :  { %3735 = vmatprep.mubr.msk.f32.mxu0 %vm3944_vm6, %v3942_v1  ;;  %v3254_v55 = vsel %vm2768_vm14, 1.0, %v3942_v1 }
0x1068   :  { %v2538_v34 = vadd.f32 %v2535_v50, %v2531_v32  ;;  %v2771_v32 = vadd.f32 2.0, %v4414_v18 }
0x106a   :  { %3736 = vmatmul.mubr.msk.f32.gmra.mxu0 %vm192_vm2, %v2538_v34  ;;  %v2772_v62 = vmul.f32 5.0, %v2771_v32 }
0x106b   :  { %3785 = vmatprep.mubr.msk.f32.mxu0 %vm3944_vm6, %v3942_v1 }
0x106c   :  { %vm2773_vm15 = vcmp.eq.f32.partialorder %v4416_v20, %v2772_v62 }
0x106d   :  { %v3255_v18 = vsel %vm2773_vm15, 1.0, %v3942_v1 }
0x1122   :  { %v2625_v8 = vpop.f32.mrf.mxu0 }
0x1123   :  { %v2626_v53 = vadd.f32 %v3249_v40, %v2625_v8  ;;  %v2967_v8 = vld [vmem:[%s4983_s16 + $0x18] sm:$0xff] }
0x1124   :  { %v3731_v23 = vpop.f32.mrf.mxu0 }
0x1125   :  { %v2639_v41 = vmul.f32 -1.702, %v2626_v53  ;;  %v2965_v23 = vld [vmem:[%s4983_s16 + $0x8] sm:$0xff] }
0x1126   :  { %v2630_v27 = vpop.f32.mrf.mxu0 }
0x1127   :  { %v2642_v42 = vmul.f32 1.442695, %v2639_v41  ;;  %v2631_v4 = vadd.f32 %v3249_v40, %v2630_v27  ;;  %v2964_v41 = vld [vmem:[%s4983_s16] sm:$0xff] }
0x1128   :  { %v3734_v51 = vpop.f32.mrf.mxu0 }
0x1129   :  { %3895 = vpow2.f32 %v2642_v42  ;;  %v2640_v44 = vmul.f32 -1.702, %v2631_v4 }
0x112a   :  { %v2635_v45 = vpop.f32.mrf.mxu0 }
0x112b   :  { %v2644_v47 = vmul.f32 1.442695, %v2640_v44  ;;  %v2636_v13 = vadd.f32 %v3249_v40, %v2635_v45 }
0x112c   :  { %v3737_v57 = vpop.f32.mrf.mxu0 }
0x112d   :  { %3897 = vpow2.f32 %v2644_v47  ;;  %v2641_v58 = vmul.f32 -1.702, %v2636_v13  ;;  %v2868_v47 = vsub.s32 6, %v4169_v12 }
0x112f   :  { %v2646_v61 = vmul.f32 1.442695, %v2641_v58  ;;  %v2869_v57 = vrot.slane %v4823_v15, %v2868_v47 }
0x1131   :  { %3899 = vpow2.f32 %v2646_v61 }
0x1136   :  { %v3896_v63 = vpop.eup %3895 }
0x1137   :  { %v2648_v43 = vadd.f32 1.0, %v3896_v63 }
0x1139   :  { %3901 = vrcp.f32 %v2648_v43 }
0x113a   :  { %v3898_v0 = vpop.eup %3897 }
0x113b   :  { %v2649_v3 = vadd.f32 1.0, %v3898_v0 }
0x113d   :  { %3903 = vrcp.f32 %v2649_v3 }
0x113e   :  { %v3900_v6 = vpop.eup %3899 }
0x113f   :  { %v2650_v7 = vadd.f32 1.0, %v3900_v6 }
0x1141   :  { %3905 = vrcp.f32 %v2650_v7 }
0x1146   :  { %v3902_v25 = vpop.eup %3901 }
0x1147   :  { %v2657_v10 = vmul.f32 %v3902_v25, %v2626_v53  ;;  %v2966_v53 = vld [vmem:[%s4983_s16 + $0x10] sm:$0xff]  ;;  %s3949_s16 = smov [#allocation2]  }
0x1148   :  { %s3164_s10 = sshll.u32 %s3949_s16, 4  ;;  %s3165_s10 = int_to_ptr.vmem [resolvable:$true] %s3164_s10 }
0x1149   :  { %3771 = vmatmul.mubr.f32.vlgmr.msra.gmra.mxu1 %v2657_v10  ;;  %s3920_s11 = scalar_lea.vmem %s3165_s10, 16  ;;  %s3924_s19 = scalar_lea.vmem %s3165_s10, 32 }
0x114a   :  { %v3904_v11 = vpop.eup %3903  ;;  %3773 = vmatprep.mubr.msk.f32.mxu1 %vm3944_vm6, %v3942_v1  ;;  %p3921_p0 = scmp.ne.s32.totalorder %s3165_s10, %s3920_s11  ;;  %p3925_p1 = scmp.lt.s32.totalorder %s3165_s10, %s3165_s10 }
0x114b   :  { %v2658_v24 = vmul.f32 %v3904_v11, %v2631_v4  ;;  %p3926_p2 = scmp.lt.s32.totalorder %s3924_s19, %s3920_s11 }
0x114d   :  { %3774 = vmatmul.mubr.f32.gmra.mxu1 %v2658_v24  ;;  %p3927_p3 = por %p3926_p2, %p3925_p1 }
0x114e   :  { %v3906_v17 = vpop.eup %3905  ;;  %3776 = vmatprep.mubr.msk.f32.mxu1 %vm3944_vm6, %v3942_v1 }
0x114f   :  { %v2659_v48 = vmul.f32 %v3906_v17, %v2636_v13  ;;  %v2873_v13 = vsub.s32 7, %v4169_v12  ;;  %p3928_p4 = pnand %p3927_p3, %p3921_p0 }
0x1151   :  { %3777 = vmatmul.mubr.f32.gmra.mxu1 %v2659_v48  ;;  %v2874_v63 = vrot.slane %v4823_v15, %v2873_v13 }
0x1209   :  { %v2749_v19 = vpop.f32.mrf.mxu1 }
0x120a   :  { %v2750_v34 = vadd.f32 %v3253_v21, %v2749_v19 }
0x120b   :  { %v3772_v50 = vpop.f32.mrf.mxu1 }
0x120c   :  { %v2763_v26 = vadd.f32 %v2750_v34, %v4780_v38 }
0x120d   :  { %v2754_v31 = vpop.f32.mrf.mxu1 }
0x120e   :  { %v2755_v54 = vadd.f32 %v3253_v21, %v2754_v31 }
0x120f   :  { %v3775_v33 = vpop.f32.mrf.mxu1 }
0x1210   :  { %v2764_v2 = vadd.f32 %v2755_v54, %v4786_v60 }
0x1211   :  { %v2759_v22 = vpop.f32.mrf.mxu1 }
0x1212   :  { %v2760_v56 = vadd.f32 %v3253_v21, %v2759_v22 }
0x1213   :  { %v3778_v14 = vpop.f32.mrf.mxu1 }
0x1214   :  { %v2765_v52 = vadd.f32 %v2760_v56, %v4792_v49 }
0x1216   :  { %3780 = vmatpush3.msk.msra.mxu0 %vm785_vm8, %v2765_v52 }
0x1217   :  { %3781 = vmatprep.subr.mxu0 %v3942_v1 }
0x1218   :  { %3782 = vmatpush3.msra.mxu0 %v2764_v2 }
0x1219   :  { %3783 = vmatprep.subr.mxu0 %v3942_v1 }
0x121a   :  { %3784 = vmatpush3.msra.mxu0 %v2763_v26 }
0x121b   :  { %3786 = vmatmul.mubr.msk.f32.vlgmr.msra.gmra.mxu0 %vm741_vm11, %v3254_v55  ;;  %3788 = vmatprep.subr.mxu0 %v3942_v1 }
0x121c   :  { %3789 = vmatpush3.msk.msra.mxu0 %vm785_vm8, %v2765_v52  ;;  %3794 = vmatprep.mubr.msk.f32.mxu0 %vm3944_vm6, %v3942_v1 }
0x121d   :  { %3790 = vmatprep.subr.mxu0 %v3942_v1 }
0x121e   :  { %3791 = vmatpush3.msra.mxu0 %v2764_v2 }
0x121f   :  { %3792 = vmatprep.subr.mxu0 %v3942_v1 }
0x1220   :  { %3793 = vmatpush3.msra.mxu0 %v2763_v26 }
0x1221   :  { %3795 = vmatmul.mubr.msk.f32.vlgmr.msra.gmra.mxu0 %vm741_vm11, %v3255_v18  ;;  %3797 = vmatprep.subr.mxu0 %v3942_v1 }
0x1222   :  { %3805 = vmatprep.mubr.msk.f32.mxu0 %vm3944_vm6, %v3942_v1  ;;  %3798 = vmatpush3.msra.mxu0 %v2967_v8 }
0x1223   :  { %3799 = vmatprep.subr.mxu0 %v3942_v1 }
0x1224   :  { %3800 = vmatpush3.msra.mxu0 %v2966_v53 }
0x1225   :  { %3801 = vmatprep.subr.mxu0 %v3942_v1 }
0x1226   :  { %3802 = vmatpush3.msra.mxu0 %v2965_v23 }
0x1227   :  { %3803 = vmatprep.subr.mxu0 %v3942_v1 }
0x1228   :  { %3804 = vmatpush3.msra.mxu0 %v2964_v41 }
0x1229   :  { %3808 = vmatprep.subr.mxu0 %v3942_v1 }
0x12db   :  { %v2848_v20 = vpop.f32.mrf.mxu0 }
0x12dc   :  { %v2853_v38 = vsel %vm2852_vm0, %v2848_v20, 0.0 }
0x12dd   :  { %2854 = vadd.xlane.f32.xlu0 %v2853_v38  ;;  %v3787_v60 = vpop.f32.mrf.mxu0 }
0x12e1   :  { %v2945_v49 = vpop.f32.mrf.mxu0 }
0x12e2   :  { %v2949_v5 = vsel %vm2852_vm0, %v2945_v49, 0.0 }
0x12e3   :  { %2950 = vadd.xlane.f32.xlu0 %v2949_v5  ;;  %v3796_v16 = vpop.f32.mrf.mxu0 }
0x1366   :  { %v2855_v28 = vpop.xlane.xlu0 %2854 }
0x1367   :  { %v2856_v35 = vmul.f32 0.03125, %v2855_v28 }
0x1369   :  { %v2857_v30 = vsub.f32 %v2848_v20, %v2856_v35 }
0x136b   :  { %v2858_v36 = vmul.f32 %v2857_v30, %v2857_v30 }
0x136c   :  { %v2951_v29 = vpop.xlane.xlu0 %2950 }
0x136d   :  { %v2952_v37 = vmul.f32 0.03125, %v2951_v29  ;;  %v2859_v9 = vsel %vm2852_vm0, %v2858_v36, 0.0 }
0x136e   :  { %2860 = vadd.xlane.f32.xlu0 %v2859_v9 }
0x136f   :  { %v2953_v59 = vsub.f32 %v2945_v49, %v2952_v37 }
0x1371   :  { %v2954_v39 = vmul.f32 %v2953_v59, %v2953_v59 }
0x1373   :  { %v2955_v40 = vsel %vm2852_vm0, %v2954_v39, 0.0 }
0x1374   :  { %2956 = vadd.xlane.f32.xlu0 %v2955_v40 }
0x13f7   :  { %v2861_v27 = vpop.xlane.xlu0 %2860 }
0x13f8   :  { %v2862_v42 = vmul.f32 0.03125, %v2861_v27 }
0x13fa   :  { %v2863_v4 = vadd.f32 1e-05, %v2862_v42 }
0x13fc   :  { %3907 = vrsqrt.f32 %v2863_v4 }
0x13fd   :  { %v2957_v51 = vpop.xlane.xlu0 %2956 }
0x13fe   :  { %v2958_v44 = vmul.f32 0.03125, %v2957_v51 }
0x1400   :  { %v2959_v45 = vadd.f32 1e-05, %v2958_v44 }
0x1402   :  { %3909 = vrsqrt.f32 %v2959_v45 }
0x1409   :  { %v3908_v58 = vpop.eup %3907 }
0x140a   :  { %v2865_v61 = vmul.f32 %v3908_v58, %v2857_v30 }
0x140c   :  { %v2870_v43 = vmul.f32 %v2869_v57, %v2865_v61 }
0x140e   :  { %v2875_v0 = vadd.f32 %v2874_v63, %v2870_v43 }
0x140f   :  { %v3910_v3 = vpop.eup %3909 }
0x1410   :  { %v2961_v6 = vmul.f32 %v3910_v3, %v2953_v59  ;;  %3806 = vmatmul.mubr.msk.f32.vlgmr.msra.gmra.mxu0 %vm192_vm2, %v2875_v0 }
0x1411   :  { %3809 = vmatpush3.msra.mxu0 %v2967_v8  ;;  %3816 = vmatprep.mubr.msk.f32.mxu0 %vm3944_vm6, %v3942_v1 }
0x1412   :  { %3810 = vmatprep.subr.mxu0 %v3942_v1  ;;  %v2962_v7 = vmul.f32 %v2961_v6, %v2869_v57 }
0x1413   :  { %3811 = vmatpush3.msra.mxu0 %v2966_v53 }
0x1414   :  { %3812 = vmatprep.subr.mxu0 %v3942_v1  ;;  %v2963_v12 = vadd.f32 %v2962_v7, %v2874_v63 }
0x1415   :  { %3813 = vmatpush3.msra.mxu0 %v2965_v23 }
0x1416   :  { %3814 = vmatprep.subr.mxu0 %v3942_v1 }
0x1417   :  { %3815 = vmatpush3.msra.mxu0 %v2964_v41 }
0x1418   :  { %3817 = vmatmul.mubr.msk.f32.vlgmr.msra.gmra.mxu0 %vm192_vm2, %v2963_v12 }
0x14d0   :  { %v3037_v15 = vpop.f32.mrf.mxu0 }
0x14d1   :  { %v3119_v25 = vmul.f32 %v3037_v15, %v3037_v15 }
0x14d2   :  { %v3807_v10 = vpop.f32.mrf.mxu0 }
0x14d3   :  { %v3120_v11 = vsel %vm3115_vm1, %v3119_v25, 0.0 }
0x14d4   :  { %3121 = vadd.xlane.f32.xlu0 %v3120_v11 }
0x14d8   :  { %v3110_v24 = vpop.f32.mrf.mxu0 }
0x14d9   :  { %v3130_v17 = vmul.f32 %v3110_v24, %v3110_v24  ;;  %v3114_v19 = vmul.f32 %v3110_v24, %v3037_v15 }
0x14da   :  { %v3818_v48 = vpop.f32.mrf.mxu0 }
0x14db   :  { %v3131_v50 = vsel %vm3115_vm1, %v3130_v17, 0.0  ;;  %v3116_v31 = vsel %vm3115_vm1, %v3114_v19, 0.0 }
0x14dc   :  { %3132 = vadd.xlane.f32.xlu0 %v3131_v50 }
0x14e0   :  { %3117 = vadd.xlane.f32.xlu0 %v3116_v31 }
0x155d   :  { %v3122_v33 = vpop.xlane.xlu0 %3121 }
0x155e   :  { %3911 = vrsqrt.f32 %v3122_v33  ;;  %vm3125_vm2 = vcmp.eq.f32.partialorder %v3122_v33, inf  ;;  %v3128_v56 = vand.u32 2147483648, %v3122_v33  ;;  %vm3127_vm4 = vcmp.eq.f32.partialorder %v3122_v33, 0.0 }
0x1565   :  { %v3133_v1 = vpop.xlane.xlu0 %3132 }
0x1566   :  { %3913 = vrsqrt.f32 %v3133_v1  ;;  %vm3136_vm5 = vcmp.eq.f32.partialorder %v3133_v1, inf  ;;  %v3139_v34 = vand.u32 2147483648, %v3133_v1  ;;  %vm3138_vm6 = vcmp.eq.f32.partialorder %v3133_v1, 0.0 }
0x1569   :  { %v3118_v20 = vpop.xlane.xlu0 %3117 }
0x156b   :  { %v3912_v21 = vpop.eup %3911 }
0x156c   :  { %v3124_v22 = vmul.f32 %v3912_v21, %v3122_v33 }
0x156e   :  { %v3126_v46 = vsel %vm3125_vm2, %v3122_v33, %v3124_v22 }
0x156f   :  { %v3129_v32 = vsel %vm3127_vm4, %v3128_v56, %v3126_v46 }
0x1570   :  { %v3141_v62 = vmax.f32 %v3129_v32, 1e-08 }
0x1573   :  { %v3914_v54 = vpop.eup %3913 }
0x1574   :  { %v3135_v14 = vmul.f32 %v3914_v54, %v3133_v1 }
0x1576   :  { %v3137_v52 = vsel %vm3136_vm5, %v3133_v1, %v3135_v14 }
0x1577   :  { %v3140_v2 = vsel %vm3138_vm6, %v3139_v34, %v3137_v52 }
0x1578   :  { %v3142_v26 = vmax.f32 %v3140_v2, 1e-08 }
0x157a   :  { %v3143_v55 = vmul.f32 %v3142_v26, %v3141_v62 }
0x157c   :  { %3915 = vrcp.f32 %v3143_v55 }
0x1589   :  { %v3916_v18 = vpop.eup %3915 }
0x158a   :  { %v3145_v38 = vmul.f32 %v3916_v18, %v3118_v20 }
0x158c   :  { %v3146_v60 = vsel %vm98_vm3, %v3145_v38, 0.0 }
0x158d   :  { %v3147_v49 = vrot.slane %v3146_v60, 4 }
0x158f   :  { %v3148_v5 = vadd.f32 %v3147_v49, %v3146_v60 }
0x1591   :  { %v3149_v16 = vrot.slane %v3148_v5, 2 }
0x1593   :  { %v3150_v28 = vadd.f32 %v3149_v16, %v3148_v5 }
0x1595   :  { %v3151_v35 = vrot.slane %v3150_v28, 1 }
0x1597   :  { %v3152_v30 = vadd.f32 %v3151_v35, %v3150_v28 }
0x1599   :  { %v3154_v36 = vmul.f32 0.5, %v3152_v30 }
0x159b   :  { %v3155_v29 = vsub.f32 1.0, %v3154_v36 }
0x159d   :  { %3157 = vst.msk [vmem:[#allocation2] sm:$0x1] %vm3156_vm7, %v3155_v29 }
0x159e   :  { %3931 = shalt.err (!%p3928_p4)
}
0x159f   :  { %3167 = dma.vmem_to_hbm [thread:$0]  %s3165_s10, 16, %s4984_s17, [#allocation3]  }
0x15a0   :  { %3940 = dma.done.wait [#allocation3], 16  }
0x15a1   :  { %3941 = vsyncadd [#allocation3], 4294967280 }
0x15a2   :  { %3171 = vsyncpa [#allocation3], 1 }

</bundles_post_ra>
